<compile_context>
chip_gen: v7x
topology: tpu7x:2x2x1
jax: 0.10.0
libtpu: 0.0.40
codegen_flags: <defaults>
</compile_context>

<pallas_src>
import jax
import jax.numpy as jnp
from jax import lax
from jax.experimental import pallas as pl
from jax.experimental.pallas import tpu as pltpu

LN_EPS = 1e-5     # torch.nn.LayerNorm default eps
MSG_EPS = 1e-7    # GENConv message eps

HIDDEN = 128      # lane-dense hidden width (multiple of 128)
MLP_DIM = 2 * HIDDEN
TASK_PAD = 128    # prediction head padded to a full lane width


def _layer_norm(x, g, b):
    mu = jnp.mean(x, axis=-1, keepdims=True)
    var = jnp.mean(jnp.square(x - mu), axis=-1, keepdims=True)
    return (x - mu) * lax.rsqrt(var + LN_EPS) * g + b


def _deeper_gcn_kernel(
    # layer-invariant inputs (loaded once; block index never changes)
    x_ref, nf1_ref, ea_ref, src_ref, dst_ref,
    oh_w_ref, oh_b_ref, nfe_wa_ref, nfe_wb_ref, nfe_b_ref, ee_w_ref, ee_b_ref,
    # per-layer (stacked) parameters, selected by the layer grid axis
    pre_g_ref, pre_b_ref, w1_ref, b1_ref, mg_ref, mb_ref, w2_ref, b2_ref,
    # head parameters
    head_g_ref, head_b_ref, pred_w_ref, pred_b_ref,
    # output
    pred_ref,
    # VMEM scratch (persists across the layer grid axis)
    h_carry, eemb, src_oh, dst_oh,
):
    layer = pl.program_id(0)
    n_layers = pl.num_programs(0)

    # ---- layer 0: run the feature encoders, build the one-hot operators ----
    @pl.when(layer == 0)
    def _():
        # node_one_hot_encoder: Linear(8, 8)
        x2 = (jnp.dot(x_ref[...], oh_w_ref[...],
                      preferred_element_type=jnp.float32) + oh_b_ref[...])
        # node_features_encoder: Linear(16, H) on concat(nf1, x2) == split matmul
        h0 = (jnp.dot(nf1_ref[...], nfe_wa_ref[...],
                      preferred_element_type=jnp.float32)
              + jnp.dot(x2, nfe_wb_ref[...],
                        preferred_element_type=jnp.float32)
              + nfe_b_ref[...])
        h_carry[...] = h0
        # edge_encoder: Linear(8, H)
        eemb[...] = (jnp.dot(ea_ref[...], ee_w_ref[...],
                             preferred_element_type=jnp.float32) + ee_b_ref[...])
        # gather / scatter-add operators, built once and reused for all layers
        e_edges, n_nodes = src_oh.shape
        lane_iota = lax.broadcasted_iota(jnp.int32, (e_edges, n_nodes), 1)
        src_oh[...] = (lane_iota == src_ref[...]).astype(jnp.bfloat16)   # (E, N)
        sub_iota = lax.broadcasted_iota(jnp.int32, (n_nodes, e_edges), 0)
        dst_oh[...] = (sub_iota == dst_ref[...]).astype(jnp.bfloat16)    # (N, E)

    # ---- res+ GENConv layer -------------------------------------------------
    h = h_carry[...]                                              # (N, H) f32

    # pre-norm block for layers >= 1: LN -> ReLU -> dropout(eval: identity)
    h_ln = jnp.maximum(_layer_norm(h, pre_g_ref[0], pre_b_ref[0]), 0.0)
    h2 = jnp.where(layer == 0, h, h_ln)

    # GENConv message: msg = relu(x_j + edge_emb) + eps; aggr = add
    x_j = jnp.dot(src_oh[...], h2.astype(jnp.bfloat16),
                  preferred_element_type=jnp.float32)             # (E, H) gather
    msg = jnp.maximum(x_j + eemb[...], 0.0) + MSG_EPS
    agg = jnp.dot(dst_oh[...], msg.astype(jnp.bfloat16),
                  preferred_element_type=jnp.float32)             # (N, H) scatter-add

    # GENConv update: h = x + m, then MLP: Lin(H,2H) -> LN -> ReLU -> Lin(2H,H)
    hh = h2 + agg
    z = (jnp.dot(hh.astype(jnp.bfloat16), w1_ref[0],
                 preferred_element_type=jnp.float32) + b1_ref[0])
    z = jnp.maximum(_layer_norm(z, mg_ref[0], mb_ref[0]), 0.0)
    out = (jnp.dot(z.astype(jnp.bfloat16), w2_ref[0],
                   preferred_element_type=jnp.float32) + b2_ref[0])

    # res+ residual (the stack's first GENConv has no residual in the reference)
    new_h = jnp.where(layer == 0, out, out + h)
    h_carry[...] = new_h

    # ---- final LN -> ReLU -> prediction linear (fused into the last step) ---
    @pl.when(layer == n_layers - 1)
    def _():
        hf = jnp.maximum(_layer_norm(new_h, head_g_ref[...], head_b_ref[...]), 0.0)
        pred_ref[...] = (jnp.dot(hf.astype(jnp.bfloat16), pred_w_ref[...],
                                 preferred_element_type=jnp.float32)
                         + pred_b_ref[...])


def deeper_gcn_forward(params, x, node_index, edge_index, edge_attr,
                       num_layers, num_tasks):
    n_nodes = x.shape[0]
    n_edges = edge_attr.shape[0]
    hidden = HIDDEN

    # ---- host-side glue: table lookup + per-layer parameter stacking --------
    nf1 = params["node_features"][node_index]                       # (N, 8)
    src = edge_index[0].astype(jnp.int32).reshape(n_edges, 1)
    dst = edge_index[1].astype(jnp.int32).reshape(1, n_edges)

    nfe_wa = params["nfe_w"][:8]
    nfe_wb = params["nfe_w"][8:]

    lns = params["layer_norms"]
    pre_g = jnp.stack([jnp.ones((1, hidden), jnp.float32)]
                      + [lns[i]["g"] for i in range(num_layers - 1)])
    pre_b = jnp.stack([jnp.zeros((1, hidden), jnp.float32)]
                      + [lns[i]["b"] for i in range(num_layers - 1)])
    gcns = params["gcns"]
    w1 = jnp.stack([g["w1"] for g in gcns]).astype(jnp.bfloat16)
    b1 = jnp.stack([g["b1"] for g in gcns])
    mg = jnp.stack([g["mlp_g"] for g in gcns])
    mb = jnp.stack([g["mlp_b"] for g in gcns])
    w2 = jnp.stack([g["w2"] for g in gcns]).astype(jnp.bfloat16)
    b2 = jnp.stack([g["b2"] for g in gcns])

    head_g = lns[num_layers - 1]["g"]
    head_b = lns[num_layers - 1]["b"]
    pred_w = jnp.zeros((hidden, TASK_PAD), jnp.float32)
    pred_w = pred_w.at[:, :num_tasks].set(params["pred_w"]).astype(jnp.bfloat16)
    pred_b = jnp.zeros((1, TASK_PAD), jnp.float32)
    pred_b = pred_b.at[:, :num_tasks].set(params["pred_b"])

    def const(shape):
        return pl.BlockSpec(shape, lambda l: (0,) * len(shape))

    def per_layer(shape):
        return pl.BlockSpec((1,) + shape, lambda l: (l, 0, 0))

    in_specs = [
        const((n_nodes, 8)),                                    # x
        const((n_nodes, 8)),                                    # nf1
        const((n_edges, 8)),                                    # edge_attr
        const((n_edges, 1)),                                    # src indices
        const((1, n_edges)),                                    # dst indices
        const((8, 8)), const((1, 8)),                           # oh_w, oh_b
        const((8, hidden)), const((8, hidden)), const((1, hidden)),  # nfe_wa/wb/b
        const((8, hidden)), const((1, hidden)),                 # ee_w, ee_b
        per_layer((1, hidden)), per_layer((1, hidden)),         # pre LN g, b
        per_layer((hidden, MLP_DIM)), per_layer((1, MLP_DIM)),  # w1, b1
        per_layer((1, MLP_DIM)), per_layer((1, MLP_DIM)),       # mlp LN g, b
        per_layer((MLP_DIM, hidden)), per_layer((1, hidden)),   # w2, b2
        const((1, hidden)), const((1, hidden)),                 # head LN g, b
        const((hidden, TASK_PAD)), const((1, TASK_PAD)),        # pred_w, pred_b
    ]

    out_padded = pl.pallas_call(
        _deeper_gcn_kernel,
        out_shape=jax.ShapeDtypeStruct((n_nodes, TASK_PAD), jnp.float32),
        grid=(num_layers,),
        in_specs=in_specs,
        out_specs=pl.BlockSpec((n_nodes, TASK_PAD), lambda l: (0, 0)),
        scratch_shapes=[
            pltpu.VMEM((n_nodes, hidden), jnp.float32),    # h carried across layers
            pltpu.VMEM((n_edges, hidden), jnp.float32),    # edge embeddings
            pltpu.VMEM((n_edges, n_nodes), jnp.bfloat16),  # gather one-hot (E,N)
            pltpu.VMEM((n_nodes, n_edges), jnp.bfloat16),  # scatter-add one-hot (N,E)
        ],
        compiler_params=pltpu.CompilerParams(
            dimension_semantics=("arbitrary",)),
    )(x, nf1, edge_attr, src, dst,
      params["oh_w"], params["oh_b"], nfe_wa, nfe_wb, params["nfe_b"],
      params["ee_w"], params["ee_b"],
      pre_g, pre_b, w1, b1, mg, mb, w2, b2,
      head_g, head_b, pred_w, pred_b)

    return out_padded[:, :num_tasks]


def init_params(key, *, hidden, num_layers, num_tasks, num_total_nodes):
    ks = iter(jax.random.split(key, 4 * num_layers + 16))

    def w(shape, scale=0.1):
        return (scale * jax.random.normal(next(ks), shape)).astype(jnp.float32)

    def zeros(shape):
        return jnp.zeros(shape, jnp.float32)

    def ones(shape):
        return jnp.ones(shape, jnp.float32)

    return {
        # stand-in for torch.load(node_features_file_path): in-script table
        "node_features": w((num_total_nodes, 8), 1.0),
        "oh_w": w((8, 8)), "oh_b": zeros((1, 8)),                 # node_one_hot_encoder
        "nfe_w": w((16, hidden)), "nfe_b": zeros((1, hidden)),    # node_features_encoder
        "ee_w": w((8, hidden)), "ee_b": zeros((1, hidden)),       # edge_encoder
        "pred_w": w((hidden, num_tasks)), "pred_b": zeros((1, num_tasks)),
        "layer_norms": [{"g": ones((1, hidden)), "b": zeros((1, hidden))}
                        for _ in range(num_layers)],
        "gcns": [{
            "w1": w((hidden, 2 * hidden)), "b1": zeros((1, 2 * hidden)),
            "mlp_g": ones((1, 2 * hidden)), "mlp_b": zeros((1, 2 * hidden)),
            "w2": w((2 * hidden, hidden)), "b2": zeros((1, hidden)),
        } for _ in range(num_layers)],
    }


if __name__ == "__main__":
    NUM_LAYERS = 3
    NUM_TASKS = 8
    N_NODES = 16
    N_EDGES = 48
    N_TOTAL_NODES = 64

    key = jax.random.PRNGKey(0)
    kp, kx, kni, kei, kea = jax.random.split(key, 5)

    params = init_params(kp, hidden=HIDDEN, num_layers=NUM_LAYERS,
                         num_tasks=NUM_TASKS, num_total_nodes=N_TOTAL_NODES)

    x = jax.random.normal(kx, (N_NODES, 8), dtype=jnp.float32)          # subgraph node feats
    node_index = jax.random.randint(kni, (N_NODES,), 0, N_TOTAL_NODES)  # real node ids
    edge_index = jax.random.randint(kei, (2, N_EDGES), 0, N_NODES)      # (src, dst)
    edge_attr = jax.random.normal(kea, (N_EDGES, 8), dtype=jnp.float32)  # edge features
    # TODO(synk): edge_mask path not exercised; forward() default is edge_mask=None.

    out = deeper_gcn_forward(params, x, node_index, edge_index, edge_attr,
                             NUM_LAYERS, NUM_TASKS)
    out = jax.block_until_ready(out)
    assert out.shape == (N_NODES, NUM_TASKS)
    print("KERNEL_OK")
</pallas_src>

<mosaic_0001>
module attributes {stable_mosaic.version = 11 : i64} {
  func.func @_deeper_gcn_kernel(%arg0: i32, %arg1: memref<16x8xf32, #tpu.memory_space<vmem>>, %arg2: memref<16x8xf32, #tpu.memory_space<vmem>>, %arg3: memref<48x8xf32, #tpu.memory_space<vmem>>, %arg4: memref<48x1xi32, #tpu.memory_space<vmem>>, %arg5: memref<1x48xi32, #tpu.memory_space<vmem>>, %arg6: memref<8x8xf32, #tpu.memory_space<vmem>>, %arg7: memref<1x8xf32, #tpu.memory_space<vmem>>, %arg8: memref<8x128xf32, #tpu.memory_space<vmem>>, %arg9: memref<8x128xf32, #tpu.memory_space<vmem>>, %arg10: memref<1x128xf32, #tpu.memory_space<vmem>>, %arg11: memref<8x128xf32, #tpu.memory_space<vmem>>, %arg12: memref<1x128xf32, #tpu.memory_space<vmem>>, %arg13: memref<1x1x128xf32, #tpu.memory_space<vmem>>, %arg14: memref<1x1x128xf32, #tpu.memory_space<vmem>>, %arg15: memref<1x128x256xbf16, #tpu.memory_space<vmem>>, %arg16: memref<1x1x256xf32, #tpu.memory_space<vmem>>, %arg17: memref<1x1x256xf32, #tpu.memory_space<vmem>>, %arg18: memref<1x1x256xf32, #tpu.memory_space<vmem>>, %arg19: memref<1x256x128xbf16, #tpu.memory_space<vmem>>, %arg20: memref<1x1x128xf32, #tpu.memory_space<vmem>>, %arg21: memref<1x128xf32, #tpu.memory_space<vmem>>, %arg22: memref<1x128xf32, #tpu.memory_space<vmem>>, %arg23: memref<128x128xbf16, #tpu.memory_space<vmem>>, %arg24: memref<1x128xf32, #tpu.memory_space<vmem>>, %arg25: memref<16x128xf32, #tpu.memory_space<vmem>>, %arg26: memref<16x128xf32, #tpu.memory_space<vmem>>, %arg27: memref<48x128xf32, #tpu.memory_space<vmem>>, %arg28: memref<48x16xbf16, #tpu.memory_space<vmem>>, %arg29: memref<16x48xbf16, #tpu.memory_space<vmem>>) attributes {dimension_semantics = [#tpu.dimension_semantics<arbitrary>], iteration_bounds = array<i64: 3>, scalar_prefetch = 0 : i64, scratch_operands = 4 : i64, tpu.core_type = #tpu.core_type<tc>, window_params = [{pipeline_mode = #tpu.pipeline_mode<synchronous>, transform_indices = @transform_0, window_bounds = array<i64: 16, 8>}, {pipeline_mode = #tpu.pipeline_mode<synchronous>, transform_indices = @transform_1, window_bounds = array<i64: 16, 8>}, {pipeline_mode = #tpu.pipeline_mode<synchronous>, transform_indices = @transform_2, window_bounds = array<i64: 48, 8>}, {pipeline_mode = #tpu.pipeline_mode<synchronous>, transform_indices = @transform_3, window_bounds = array<i64: 48, 1>}, {pipeline_mode = #tpu.pipeline_mode<synchronous>, transform_indices = @transform_4, window_bounds = array<i64: 1, 48>}, {pipeline_mode = #tpu.pipeline_mode<synchronous>, transform_indices = @transform_5, window_bounds = array<i64: 8, 8>}, {pipeline_mode = #tpu.pipeline_mode<synchronous>, transform_indices = @transform_6, window_bounds = array<i64: 1, 8>}, {pipeline_mode = #tpu.pipeline_mode<synchronous>, transform_indices = @transform_7, window_bounds = array<i64: 8, 128>}, {pipeline_mode = #tpu.pipeline_mode<synchronous>, transform_indices = @transform_8, window_bounds = array<i64: 8, 128>}, {pipeline_mode = #tpu.pipeline_mode<synchronous>, transform_indices = @transform_9, window_bounds = array<i64: 1, 128>}, {pipeline_mode = #tpu.pipeline_mode<synchronous>, transform_indices = @transform_10, window_bounds = array<i64: 8, 128>}, {pipeline_mode = #tpu.pipeline_mode<synchronous>, transform_indices = @transform_11, window_bounds = array<i64: 1, 128>}, {transform_indices = @transform_12, window_bounds = array<i64: 1, 1, 128>}, {transform_indices = @transform_13, window_bounds = array<i64: 1, 1, 128>}, {transform_indices = @transform_14, window_bounds = array<i64: 1, 128, 256>}, {transform_indices = @transform_15, window_bounds = array<i64: 1, 1, 256>}, {transform_indices = @transform_16, window_bounds = array<i64: 1, 1, 256>}, {transform_indices = @transform_17, window_bounds = array<i64: 1, 1, 256>}, {transform_indices = @transform_18, window_bounds = array<i64: 1, 256, 128>}, {transform_indices = @transform_19, window_bounds = array<i64: 1, 1, 128>}, {pipeline_mode = #tpu.pipeline_mode<synchronous>, transform_indices = @transform_20, window_bounds = array<i64: 1, 128>}, {pipeline_mode = #tpu.pipeline_mode<synchronous>, transform_indices = @transform_21, window_bounds = array<i64: 1, 128>}, {pipeline_mode = #tpu.pipeline_mode<synchronous>, transform_indices = @transform_22, window_bounds = array<i64: 128, 128>}, {pipeline_mode = #tpu.pipeline_mode<synchronous>, transform_indices = @transform_23, window_bounds = array<i64: 1, 128>}, {pipeline_mode = #tpu.pipeline_mode<synchronous>, transform_indices = @transform_24, window_bounds = array<i64: 16, 128>}]} {
    %c0_i32 = arith.constant 0 : i32
    %0 = arith.cmpi eq, %arg0, %c0_i32 : i32
    %1 = arith.extui %0 : i1 to i32
    %c0_i32_0 = arith.constant 0 : i32
    %2 = arith.cmpi ne, %1, %c0_i32_0 : i32
    scf.if %2 {
      %c0_54 = arith.constant 0 : index
      %c0_55 = arith.constant 0 : index
      %98 = vector.load %arg1[%c0_54, %c0_55] : memref<16x8xf32, #tpu.memory_space<vmem>>, vector<16x8xf32>
      %c0_56 = arith.constant 0 : index
      %c0_57 = arith.constant 0 : index
      %99 = vector.load %arg6[%c0_56, %c0_57] : memref<8x8xf32, #tpu.memory_space<vmem>>, vector<8x8xf32>
      %cst_58 = arith.constant dense<0.000000e+00> : vector<16x8xf32>
      %100 = tpu.matmul %98, %99, %cst_58 {dimension_numbers = #tpu.dot_dimension_numbers<[1], [0], [0], [1], [0, 0, 1, 1], [], []>} : vector<16x8xf32>, vector<8x8xf32>, vector<16x8xf32> -> vector<16x8xf32>
      %c0_59 = arith.constant 0 : index
      %c0_60 = arith.constant 0 : index
      %101 = vector.load %arg7[%c0_59, %c0_60] : memref<1x8xf32, #tpu.memory_space<vmem>>, vector<1x8xf32>
      %102 = vector.broadcast %101 : vector<1x8xf32> to vector<16x8xf32>
      %103 = arith.addf %100, %102 : vector<16x8xf32>
      %c0_61 = arith.constant 0 : index
      %c0_62 = arith.constant 0 : index
      %104 = vector.load %arg2[%c0_61, %c0_62] : memref<16x8xf32, #tpu.memory_space<vmem>>, vector<16x8xf32>
      %c0_63 = arith.constant 0 : index
      %c0_64 = arith.constant 0 : index
      %105 = vector.load %arg8[%c0_63, %c0_64] : memref<8x128xf32, #tpu.memory_space<vmem>>, vector<8x128xf32>
      %cst_65 = arith.constant dense<0.000000e+00> : vector<16x128xf32>
      %106 = tpu.matmul %104, %105, %cst_65 {dimension_numbers = #tpu.dot_dimension_numbers<[1], [0], [0], [1], [0, 0, 1, 1], [], []>} : vector<16x8xf32>, vector<8x128xf32>, vector<16x128xf32> -> vector<16x128xf32>
      %c0_66 = arith.constant 0 : index
      %c0_67 = arith.constant 0 : index
      %107 = vector.load %arg9[%c0_66, %c0_67] : memref<8x128xf32, #tpu.memory_space<vmem>>, vector<8x128xf32>
      %cst_68 = arith.constant dense<0.000000e+00> : vector<16x128xf32>
      %108 = tpu.matmul %103, %107, %cst_68 {dimension_numbers = #tpu.dot_dimension_numbers<[1], [0], [0], [1], [0, 0, 1, 1], [], []>} : vector<16x8xf32>, vector<8x128xf32>, vector<16x128xf32> -> vector<16x128xf32>
      %109 = arith.addf %106, %108 : vector<16x128xf32>
      %c0_69 = arith.constant 0 : index
      %c0_70 = arith.constant 0 : index
      %110 = vector.load %arg10[%c0_69, %c0_70] : memref<1x128xf32, #tpu.memory_space<vmem>>, vector<1x128xf32>
      %111 = vector.broadcast %110 : vector<1x128xf32> to vector<16x128xf32>
      %112 = arith.addf %109, %111 : vector<16x128xf32>
      %c0_71 = arith.constant 0 : index
      %c0_72 = arith.constant 0 : index
      %113 = vector.load %arg26[%c0_71, %c0_72] : memref<16x128xf32, #tpu.memory_space<vmem>>, vector<16x128xf32>
      tpu.vector_store %arg26[%c0_71, %c0_72], %112 {strides = array<i32>} : memref<16x128xf32, #tpu.memory_space<vmem>>, vector<16x128xf32>,
      %c0_73 = arith.constant 0 : index
      %c0_74 = arith.constant 0 : index
      %114 = vector.load %arg3[%c0_73, %c0_74] : memref<48x8xf32, #tpu.memory_space<vmem>>, vector<48x8xf32>
      %c0_75 = arith.constant 0 : index
      %c0_76 = arith.constant 0 : index
      %115 = vector.load %arg11[%c0_75, %c0_76] : memref<8x128xf32, #tpu.memory_space<vmem>>, vector<8x128xf32>
      %cst_77 = arith.constant dense<0.000000e+00> : vector<48x128xf32>
      %116 = tpu.matmul %114, %115, %cst_77 {dimension_numbers = #tpu.dot_dimension_numbers<[1], [0], [0], [1], [0, 0, 1, 1], [], []>} : vector<48x8xf32>, vector<8x128xf32>, vector<48x128xf32> -> vector<48x128xf32>
      %c0_78 = arith.constant 0 : index
      %c0_79 = arith.constant 0 : index
      %117 = vector.load %arg12[%c0_78, %c0_79] : memref<1x128xf32, #tpu.memory_space<vmem>>, vector<1x128xf32>
      %118 = vector.broadcast %117 : vector<1x128xf32> to vector<48x128xf32>
      %119 = arith.addf %116, %118 : vector<48x128xf32>
      %c0_80 = arith.constant 0 : index
      %c0_81 = arith.constant 0 : index
      %120 = vector.load %arg27[%c0_80, %c0_81] : memref<48x128xf32, #tpu.memory_space<vmem>>, vector<48x128xf32>
      tpu.vector_store %arg27[%c0_80, %c0_81], %119 {strides = array<i32>} : memref<48x128xf32, #tpu.memory_space<vmem>>, vector<48x128xf32>,
      %121 = tpu.iota {dimensions = array<i32: 1>} : vector<48x16xi32>
      %c0_82 = arith.constant 0 : index
      %c0_83 = arith.constant 0 : index
      %122 = vector.load %arg4[%c0_82, %c0_83] : memref<48x1xi32, #tpu.memory_space<vmem>>, vector<48x1xi32>
      %123 = vector.broadcast %122 : vector<48x1xi32> to vector<48x16xi32>
      %124 = arith.cmpi eq, %121, %123 : vector<48x16xi32>
      %125 = arith.extui %124 : vector<48x16xi1> to vector<48x16xi32>
      %126 = arith.sitofp %125 : vector<48x16xi32> to vector<48x16xf32>
      %127 = arith.truncf %126 : vector<48x16xf32> to vector<48x16xbf16>
      %c0_84 = arith.constant 0 : index
      %c0_85 = arith.constant 0 : index
      %128 = vector.load %arg28[%c0_84, %c0_85] : memref<48x16xbf16, #tpu.memory_space<vmem>>, vector<48x16xbf16>
      tpu.vector_store %arg28[%c0_84, %c0_85], %127 {strides = array<i32>} : memref<48x16xbf16, #tpu.memory_space<vmem>>, vector<48x16xbf16>,
      %129 = tpu.iota {dimensions = array<i32: 0>} : vector<16x48xi32>
      %c0_86 = arith.constant 0 : index
      %c0_87 = arith.constant 0 : index
      %130 = vector.load %arg5[%c0_86, %c0_87] : memref<1x48xi32, #tpu.memory_space<vmem>>, vector<1x48xi32>
      %131 = vector.broadcast %130 : vector<1x48xi32> to vector<16x48xi32>
      %132 = arith.cmpi eq, %129, %131 : vector<16x48xi32>
      %133 = arith.extui %132 : vector<16x48xi1> to vector<16x48xi32>
      %134 = arith.sitofp %133 : vector<16x48xi32> to vector<16x48xf32>
      %135 = arith.truncf %134 : vector<16x48xf32> to vector<16x48xbf16>
      %c0_88 = arith.constant 0 : index
      %c0_89 = arith.constant 0 : index
      %136 = vector.load %arg29[%c0_88, %c0_89] : memref<16x48xbf16, #tpu.memory_space<vmem>>, vector<16x48xbf16>
      tpu.vector_store %arg29[%c0_88, %c0_89], %135 {strides = array<i32>} : memref<16x48xbf16, #tpu.memory_space<vmem>>, vector<16x48xbf16>,
    } else {
    }
    %c0 = arith.constant 0 : index
    %c0_1 = arith.constant 0 : index
    %3 = vector.load %arg26[%c0, %c0_1] : memref<16x128xf32, #tpu.memory_space<vmem>>, vector<16x128xf32>
    %c0_2 = arith.constant 0 : index
    %c0_3 = arith.constant 0 : index
    %c0_4 = arith.constant 0 : index
    %4 = vector.load %arg13[%c0_2, %c0_3, %c0_4] : memref<1x1x128xf32, #tpu.memory_space<vmem>>, vector<1x1x128xf32>
    %5 = vector.shape_cast %4 : vector<1x1x128xf32> to vector<1x128xf32>
    %c0_5 = arith.constant 0 : index
    %c0_6 = arith.constant 0 : index
    %c0_7 = arith.constant 0 : index
    %6 = vector.load %arg14[%c0_5, %c0_6, %c0_7] : memref<1x1x128xf32, #tpu.memory_space<vmem>>, vector<1x1x128xf32>
    %7 = vector.shape_cast %6 : vector<1x1x128xf32> to vector<1x128xf32>
    %cst = arith.constant dense<0.000000e+00> : vector<16xf32>
    %8 = vector.multi_reduction <add>, %3, %cst [1] : vector<16x128xf32> to vector<16xf32>
    %9 = vector.shape_cast %8 : vector<16xf32> to vector<16x1xf32>
    %cst_8 = arith.constant 1.280000e+02 : f32
    %10 = vector.broadcast %cst_8 : f32 to vector<16x1xf32>
    %11 = arith.divf %9, %10 : vector<16x1xf32>
    %12 = vector.broadcast %11 : vector<16x1xf32> to vector<16x128xf32>
    %13 = arith.subf %3, %12 : vector<16x128xf32>
    %14 = arith.mulf %13, %13 : vector<16x128xf32>
    %cst_9 = arith.constant dense<0.000000e+00> : vector<16xf32>
    %15 = vector.multi_reduction <add>, %14, %cst_9 [1] : vector<16x128xf32> to vector<16xf32>
    %16 = vector.shape_cast %15 : vector<16xf32> to vector<16x1xf32>
    %cst_10 = arith.constant 1.280000e+02 : f32
    %17 = vector.broadcast %cst_10 : f32 to vector<16x1xf32>
    %18 = arith.divf %16, %17 : vector<16x1xf32>
    %19 = vector.broadcast %11 : vector<16x1xf32> to vector<16x128xf32>
    %20 = arith.subf %3, %19 : vector<16x128xf32>
    %cst_11 = arith.constant 9.99999974E-6 : f32
    %21 = vector.broadcast %cst_11 : f32 to vector<16x1xf32>
    %22 = arith.addf %18, %21 : vector<16x1xf32>
    %23 = math.rsqrt %22 : vector<16x1xf32>
    %24 = vector.broadcast %23 : vector<16x1xf32> to vector<16x128xf32>
    %25 = arith.mulf %20, %24 : vector<16x128xf32>
    %26 = vector.broadcast %5 : vector<1x128xf32> to vector<16x128xf32>
    %27 = arith.mulf %25, %26 : vector<16x128xf32>
    %28 = vector.broadcast %7 : vector<1x128xf32> to vector<16x128xf32>
    %29 = arith.addf %27, %28 : vector<16x128xf32>
    %cst_12 = arith.constant 0.000000e+00 : f32
    %30 = vector.broadcast %cst_12 : f32 to vector<16x128xf32>
    %31 = arith.maximumf %29, %30 : vector<16x128xf32>
    %c0_i32_13 = arith.constant 0 : i32
    %32 = arith.cmpi eq, %arg0, %c0_i32_13 : i32
    %33 = arith.select %32, %3, %31 : vector<16x128xf32>
    %c0_14 = arith.constant 0 : index
    %c0_15 = arith.constant 0 : index
    %34 = vector.load %arg28[%c0_14, %c0_15] : memref<48x16xbf16, #tpu.memory_space<vmem>>, vector<48x16xbf16>
    %35 = arith.truncf %33 : vector<16x128xf32> to vector<16x128xbf16>
    %cst_16 = arith.constant dense<0.000000e+00> : vector<48x128xf32>
    %36 = tpu.matmul %34, %35, %cst_16 {dimension_numbers = #tpu.dot_dimension_numbers<[1], [0], [0], [1], [0, 0, 1, 1], [], []>} : vector<48x16xbf16>, vector<16x128xbf16>, vector<48x128xf32> -> vector<48x128xf32>
    %c0_17 = arith.constant 0 : index
    %c0_18 = arith.constant 0 : index
    %37 = vector.load %arg27[%c0_17, %c0_18] : memref<48x128xf32, #tpu.memory_space<vmem>>, vector<48x128xf32>
    %38 = arith.addf %36, %37 : vector<48x128xf32>
    %cst_19 = arith.constant 0.000000e+00 : f32
    %39 = vector.broadcast %cst_19 : f32 to vector<48x128xf32>
    %40 = arith.maximumf %38, %39 : vector<48x128xf32>
    %cst_20 = arith.constant 1.000000e-07 : f32
    %41 = vector.broadcast %cst_20 : f32 to vector<48x128xf32>
    %42 = arith.addf %40, %41 : vector<48x128xf32>
    %c0_21 = arith.constant 0 : index
    %c0_22 = arith.constant 0 : index
    %43 = vector.load %arg29[%c0_21, %c0_22] : memref<16x48xbf16, #tpu.memory_space<vmem>>, vector<16x48xbf16>
    %44 = arith.truncf %42 : vector<48x128xf32> to vector<48x128xbf16>
    %cst_23 = arith.constant dense<0.000000e+00> : vector<16x128xf32>
    %45 = tpu.matmul %43, %44, %cst_23 {dimension_numbers = #tpu.dot_dimension_numbers<[1], [0], [0], [1], [0, 0, 1, 1], [], []>} : vector<16x48xbf16>, vector<48x128xbf16>, vector<16x128xf32> -> vector<16x128xf32>
    %46 = arith.addf %33, %45 : vector<16x128xf32>
    %47 = arith.truncf %46 : vector<16x128xf32> to vector<16x128xbf16>
    %c0_24 = arith.constant 0 : index
    %c0_25 = arith.constant 0 : index
    %c0_26 = arith.constant 0 : index
    %48 = vector.load %arg15[%c0_24, %c0_25, %c0_26] : memref<1x128x256xbf16, #tpu.memory_space<vmem>>, vector<1x128x256xbf16>
    %49 = vector.shape_cast %48 : vector<1x128x256xbf16> to vector<128x256xbf16>
    %cst_27 = arith.constant dense<0.000000e+00> : vector<16x256xf32>
    %50 = tpu.matmul %47, %49, %cst_27 {dimension_numbers = #tpu.dot_dimension_numbers<[1], [0], [0], [1], [0, 0, 1, 1], [], []>} : vector<16x128xbf16>, vector<128x256xbf16>, vector<16x256xf32> -> vector<16x256xf32>
    %c0_28 = arith.constant 0 : index
    %c0_29 = arith.constant 0 : index
    %c0_30 = arith.constant 0 : index
    %51 = vector.load %arg16[%c0_28, %c0_29, %c0_30] : memref<1x1x256xf32, #tpu.memory_space<vmem>>, vector<1x1x256xf32>
    %52 = vector.shape_cast %51 : vector<1x1x256xf32> to vector<1x256xf32>
    %53 = vector.broadcast %52 : vector<1x256xf32> to vector<16x256xf32>
    %54 = arith.addf %50, %53 : vector<16x256xf32>
    %c0_31 = arith.constant 0 : index
    %c0_32 = arith.constant 0 : index
    %c0_33 = arith.constant 0 : index
    %55 = vector.load %arg17[%c0_31, %c0_32, %c0_33] : memref<1x1x256xf32, #tpu.memory_space<vmem>>, vector<1x1x256xf32>
    %56 = vector.shape_cast %55 : vector<1x1x256xf32> to vector<1x256xf32>
    %c0_34 = arith.constant 0 : index
    %c0_35 = arith.constant 0 : index
    %c0_36 = arith.constant 0 : index
    %57 = vector.load %arg18[%c0_34, %c0_35, %c0_36] : memref<1x1x256xf32, #tpu.memory_space<vmem>>, vector<1x1x256xf32>
    %58 = vector.shape_cast %57 : vector<1x1x256xf32> to vector<1x256xf32>
    %cst_37 = arith.constant dense<0.000000e+00> : vector<16xf32>
    %59 = vector.multi_reduction <add>, %54, %cst_37 [1] : vector<16x256xf32> to vector<16xf32>
    %60 = vector.shape_cast %59 : vector<16xf32> to vector<16x1xf32>
    %cst_38 = arith.constant 2.560000e+02 : f32
    %61 = vector.broadcast %cst_38 : f32 to vector<16x1xf32>
    %62 = arith.divf %60, %61 : vector<16x1xf32>
    %63 = vector.broadcast %62 : vector<16x1xf32> to vector<16x256xf32>
    %64 = arith.subf %54, %63 : vector<16x256xf32>
    %65 = arith.mulf %64, %64 : vector<16x256xf32>
    %cst_39 = arith.constant dense<0.000000e+00> : vector<16xf32>
    %66 = vector.multi_reduction <add>, %65, %cst_39 [1] : vector<16x256xf32> to vector<16xf32>
    %67 = vector.shape_cast %66 : vector<16xf32> to vector<16x1xf32>
    %cst_40 = arith.constant 2.560000e+02 : f32
    %68 = vector.broadcast %cst_40 : f32 to vector<16x1xf32>
    %69 = arith.divf %67, %68 : vector<16x1xf32>
    %70 = vector.broadcast %62 : vector<16x1xf32> to vector<16x256xf32>
    %71 = arith.subf %54, %70 : vector<16x256xf32>
    %cst_41 = arith.constant 9.99999974E-6 : f32
    %72 = vector.broadcast %cst_41 : f32 to vector<16x1xf32>
    %73 = arith.addf %69, %72 : vector<16x1xf32>
    %74 = math.rsqrt %73 : vector<16x1xf32>
    %75 = vector.broadcast %74 : vector<16x1xf32> to vector<16x256xf32>
    %76 = arith.mulf %71, %75 : vector<16x256xf32>
    %77 = vector.broadcast %56 : vector<1x256xf32> to vector<16x256xf32>
    %78 = arith.mulf %76, %77 : vector<16x256xf32>
    %79 = vector.broadcast %58 : vector<1x256xf32> to vector<16x256xf32>
    %80 = arith.addf %78, %79 : vector<16x256xf32>
    %cst_42 = arith.constant 0.000000e+00 : f32
    %81 = vector.broadcast %cst_42 : f32 to vector<16x256xf32>
    %82 = arith.maximumf %80, %81 : vector<16x256xf32>
    %83 = arith.truncf %82 : vector<16x256xf32> to vector<16x256xbf16>
    %c0_43 = arith.constant 0 : index
    %c0_44 = arith.constant 0 : index
    %c0_45 = arith.constant 0 : index
    %84 = vector.load %arg19[%c0_43, %c0_44, %c0_45] : memref<1x256x128xbf16, #tpu.memory_space<vmem>>, vector<1x256x128xbf16>
    %85 = vector.shape_cast %84 : vector<1x256x128xbf16> to vector<256x128xbf16>
    %cst_46 = arith.constant dense<0.000000e+00> : vector<16x128xf32>
    %86 = tpu.matmul %83, %85, %cst_46 {dimension_numbers = #tpu.dot_dimension_numbers<[1], [0], [0], [1], [0, 0, 1, 1], [], []>} : vector<16x256xbf16>, vector<256x128xbf16>, vector<16x128xf32> -> vector<16x128xf32>
    %c0_47 = arith.constant 0 : index
    %c0_48 = arith.constant 0 : index
    %c0_49 = arith.constant 0 : index
    %87 = vector.load %arg20[%c0_47, %c0_48, %c0_49] : memref<1x1x128xf32, #tpu.memory_space<vmem>>, vector<1x1x128xf32>
    %88 = vector.shape_cast %87 : vector<1x1x128xf32> to vector<1x128xf32>
    %89 = vector.broadcast %88 : vector<1x128xf32> to vector<16x128xf32>
    %90 = arith.addf %86, %89 : vector<16x128xf32>
    %c0_i32_50 = arith.constant 0 : i32
    %91 = arith.cmpi eq, %arg0, %c0_i32_50 : i32
    %92 = arith.addf %90, %3 : vector<16x128xf32>
    %93 = arith.select %91, %90, %92 : vector<16x128xf32>
    %c0_51 = arith.constant 0 : index
    %c0_52 = arith.constant 0 : index
    %94 = vector.load %arg26[%c0_51, %c0_52] : memref<16x128xf32, #tpu.memory_space<vmem>>, vector<16x128xf32>
    tpu.vector_store %arg26[%c0_51, %c0_52], %93 {strides = array<i32>} : memref<16x128xf32, #tpu.memory_space<vmem>>, vector<16x128xf32>,
    %c2_i32 = arith.constant 2 : i32
    %95 = arith.cmpi eq, %arg0, %c2_i32 : i32
    %96 = arith.extui %95 : i1 to i32
    %c0_i32_53 = arith.constant 0 : i32
    %97 = arith.cmpi ne, %96, %c0_i32_53 : i32
    scf.if %97 {
      %c0_54 = arith.constant 0 : index
      %c0_55 = arith.constant 0 : index
      %98 = vector.load %arg21[%c0_54, %c0_55] : memref<1x128xf32, #tpu.memory_space<vmem>>, vector<1x128xf32>
      %c0_56 = arith.constant 0 : index
      %c0_57 = arith.constant 0 : index
      %99 = vector.load %arg22[%c0_56, %c0_57] : memref<1x128xf32, #tpu.memory_space<vmem>>, vector<1x128xf32>
      %cst_58 = arith.constant dense<0.000000e+00> : vector<16xf32>
      %100 = vector.multi_reduction <add>, %93, %cst_58 [1] : vector<16x128xf32> to vector<16xf32>
      %101 = vector.shape_cast %100 : vector<16xf32> to vector<16x1xf32>
      %cst_59 = arith.constant 1.280000e+02 : f32
      %102 = vector.broadcast %cst_59 : f32 to vector<16x1xf32>
      %103 = arith.divf %101, %102 : vector<16x1xf32>
      %104 = vector.broadcast %103 : vector<16x1xf32> to vector<16x128xf32>
      %105 = arith.subf %93, %104 : vector<16x128xf32>
      %106 = arith.mulf %105, %105 : vector<16x128xf32>
      %cst_60 = arith.constant dense<0.000000e+00> : vector<16xf32>
      %107 = vector.multi_reduction <add>, %106, %cst_60 [1] : vector<16x128xf32> to vector<16xf32>
      %108 = vector.shape_cast %107 : vector<16xf32> to vector<16x1xf32>
      %cst_61 = arith.constant 1.280000e+02 : f32
      %109 = vector.broadcast %cst_61 : f32 to vector<16x1xf32>
      %110 = arith.divf %108, %109 : vector<16x1xf32>
      %111 = vector.broadcast %103 : vector<16x1xf32> to vector<16x128xf32>
      %112 = arith.subf %93, %111 : vector<16x128xf32>
      %cst_62 = arith.constant 9.99999974E-6 : f32
      %113 = vector.broadcast %cst_62 : f32 to vector<16x1xf32>
      %114 = arith.addf %110, %113 : vector<16x1xf32>
      %115 = math.rsqrt %114 : vector<16x1xf32>
      %116 = vector.broadcast %115 : vector<16x1xf32> to vector<16x128xf32>
      %117 = arith.mulf %112, %116 : vector<16x128xf32>
      %118 = vector.broadcast %98 : vector<1x128xf32> to vector<16x128xf32>
      %119 = arith.mulf %117, %118 : vector<16x128xf32>
      %120 = vector.broadcast %99 : vector<1x128xf32> to vector<16x128xf32>
      %121 = arith.addf %119, %120 : vector<16x128xf32>
      %cst_63 = arith.constant 0.000000e+00 : f32
      %122 = vector.broadcast %cst_63 : f32 to vector<16x128xf32>
      %123 = arith.maximumf %121, %122 : vector<16x128xf32>
      %124 = arith.truncf %123 : vector<16x128xf32> to vector<16x128xbf16>
      %c0_64 = arith.constant 0 : index
      %c0_65 = arith.constant 0 : index
      %125 = vector.load %arg23[%c0_64, %c0_65] : memref<128x128xbf16, #tpu.memory_space<vmem>>, vector<128x128xbf16>
      %cst_66 = arith.constant dense<0.000000e+00> : vector<16x128xf32>
      %126 = tpu.matmul %124, %125, %cst_66 {dimension_numbers = #tpu.dot_dimension_numbers<[1], [0], [0], [1], [0, 0, 1, 1], [], []>} : vector<16x128xbf16>, vector<128x128xbf16>, vector<16x128xf32> -> vector<16x128xf32>
      %c0_67 = arith.constant 0 : index
      %c0_68 = arith.constant 0 : index
      %127 = vector.load %arg24[%c0_67, %c0_68] : memref<1x128xf32, #tpu.memory_space<vmem>>, vector<1x128xf32>
      %128 = vector.broadcast %127 : vector<1x128xf32> to vector<16x128xf32>
      %129 = arith.addf %126, %128 : vector<16x128xf32>
      %c0_69 = arith.constant 0 : index
      %c0_70 = arith.constant 0 : index
      %130 = vector.load %arg25[%c0_69, %c0_70] : memref<16x128xf32, #tpu.memory_space<vmem>>, vector<16x128xf32>
      tpu.vector_store %arg25[%c0_69, %c0_70], %129 {strides = array<i32>} : memref<16x128xf32, #tpu.memory_space<vmem>>, vector<16x128xf32>,
    } else {
    }
    return
  }
  func.func @transform_0(%arg0: i32) -> (i32, i32) {
    %c0_i32 = arith.constant 0 : i32
    %c0_i32_0 = arith.constant 0 : i32
    %c0_i32_1 = arith.constant 0 : i32
    return %c0_i32, %c0_i32_0 : i32, i32
  }
  func.func @transform_1(%arg0: i32) -> (i32, i32) {
    %c0_i32 = arith.constant 0 : i32
    %c0_i32_0 = arith.constant 0 : i32
    %c0_i32_1 = arith.constant 0 : i32
    return %c0_i32, %c0_i32_0 : i32, i32
  }
  func.func @transform_2(%arg0: i32) -> (i32, i32) {
    %c0_i32 = arith.constant 0 : i32
    %c0_i32_0 = arith.constant 0 : i32
    %c0_i32_1 = arith.constant 0 : i32
    return %c0_i32, %c0_i32_0 : i32, i32
  }
  func.func @transform_3(%arg0: i32) -> (i32, i32) {
    %c0_i32 = arith.constant 0 : i32
    %c0_i32_0 = arith.constant 0 : i32
    %c0_i32_1 = arith.constant 0 : i32
    return %c0_i32, %c0_i32_0 : i32, i32
  }
  func.func @transform_4(%arg0: i32) -> (i32, i32) {
    %c0_i32 = arith.constant 0 : i32
    %c0_i32_0 = arith.constant 0 : i32
    %c0_i32_1 = arith.constant 0 : i32
    return %c0_i32, %c0_i32_0 : i32, i32
  }
  func.func @transform_5(%arg0: i32) -> (i32, i32) {
    %c0_i32 = arith.constant 0 : i32
    %c0_i32_0 = arith.constant 0 : i32
    %c0_i32_1 = arith.constant 0 : i32
    return %c0_i32, %c0_i32_0 : i32, i32
  }
  func.func @transform_6(%arg0: i32) -> (i32, i32) {
    %c0_i32 = arith.constant 0 : i32
    %c0_i32_0 = arith.constant 0 : i32
    %c0_i32_1 = arith.constant 0 : i32
    return %c0_i32, %c0_i32_0 : i32, i32
  }
  func.func @transform_7(%arg0: i32) -> (i32, i32) {
    %c0_i32 = arith.constant 0 : i32
    %c0_i32_0 = arith.constant 0 : i32
    %c0_i32_1 = arith.constant 0 : i32
    return %c0_i32, %c0_i32_0 : i32, i32
  }
  func.func @transform_8(%arg0: i32) -> (i32, i32) {
    %c0_i32 = arith.constant 0 : i32
    %c0_i32_0 = arith.constant 0 : i32
    %c0_i32_1 = arith.constant 0 : i32
    return %c0_i32, %c0_i32_0 : i32, i32
  }
  func.func @transform_9(%arg0: i32) -> (i32, i32) {
    %c0_i32 = arith.constant 0 : i32
    %c0_i32_0 = arith.constant 0 : i32
    %c0_i32_1 = arith.constant 0 : i32
    return %c0_i32, %c0_i32_0 : i32, i32
  }
  func.func @transform_10(%arg0: i32) -> (i32, i32) {
    %c0_i32 = arith.constant 0 : i32
    %c0_i32_0 = arith.constant 0 : i32
    %c0_i32_1 = arith.constant 0 : i32
    return %c0_i32, %c0_i32_0 : i32, i32
  }
  func.func @transform_11(%arg0: i32) -> (i32, i32) {
    %c0_i32 = arith.constant 0 : i32
    %c0_i32_0 = arith.constant 0 : i32
    %c0_i32_1 = arith.constant 0 : i32
    return %c0_i32, %c0_i32_0 : i32, i32
  }
  func.func @transform_12(%arg0: i32) -> (i32, i32, i32) {
    %c0_i32 = arith.constant 0 : i32
    %c0_i32_0 = arith.constant 0 : i32
    %c0_i32_1 = arith.constant 0 : i32
    return %arg0, %c0_i32, %c0_i32_0 : i32, i32, i32
  }
  func.func @transform_13(%arg0: i32) -> (i32, i32, i32) {
    %c0_i32 = arith.constant 0 : i32
    %c0_i32_0 = arith.constant 0 : i32
    %c0_i32_1 = arith.constant 0 : i32
    return %arg0, %c0_i32, %c0_i32_0 : i32, i32, i32
  }
  func.func @transform_14(%arg0: i32) -> (i32, i32, i32) {
    %c0_i32 = arith.constant 0 : i32
    %c0_i32_0 = arith.constant 0 : i32
    %c0_i32_1 = arith.constant 0 : i32
    return %arg0, %c0_i32, %c0_i32_0 : i32, i32, i32
  }
  func.func @transform_15(%arg0: i32) -> (i32, i32, i32) {
    %c0_i32 = arith.constant 0 : i32
    %c0_i32_0 = arith.constant 0 : i32
    %c0_i32_1 = arith.constant 0 : i32
    return %arg0, %c0_i32, %c0_i32_0 : i32, i32, i32
  }
  func.func @transform_16(%arg0: i32) -> (i32, i32, i32) {
    %c0_i32 = arith.constant 0 : i32
    %c0_i32_0 = arith.constant 0 : i32
    %c0_i32_1 = arith.constant 0 : i32
    return %arg0, %c0_i32, %c0_i32_0 : i32, i32, i32
  }
  func.func @transform_17(%arg0: i32) -> (i32, i32, i32) {
    %c0_i32 = arith.constant 0 : i32
    %c0_i32_0 = arith.constant 0 : i32
    %c0_i32_1 = arith.constant 0 : i32
    return %arg0, %c0_i32, %c0_i32_0 : i32, i32, i32
  }
  func.func @transform_18(%arg0: i32) -> (i32, i32, i32) {
    %c0_i32 = arith.constant 0 : i32
    %c0_i32_0 = arith.constant 0 : i32
    %c0_i32_1 = arith.constant 0 : i32
    return %arg0, %c0_i32, %c0_i32_0 : i32, i32, i32
  }
  func.func @transform_19(%arg0: i32) -> (i32, i32, i32) {
    %c0_i32 = arith.constant 0 : i32
    %c0_i32_0 = arith.constant 0 : i32
    %c0_i32_1 = arith.constant 0 : i32
    return %arg0, %c0_i32, %c0_i32_0 : i32, i32, i32
  }
  func.func @transform_20(%arg0: i32) -> (i32, i32) {
    %c0_i32 = arith.constant 0 : i32
    %c0_i32_0 = arith.constant 0 : i32
    %c0_i32_1 = arith.constant 0 : i32
    return %c0_i32, %c0_i32_0 : i32, i32
  }
  func.func @transform_21(%arg0: i32) -> (i32, i32) {
    %c0_i32 = arith.constant 0 : i32
    %c0_i32_0 = arith.constant 0 : i32
    %c0_i32_1 = arith.constant 0 : i32
    return %c0_i32, %c0_i32_0 : i32, i32
  }
  func.func @transform_22(%arg0: i32) -> (i32, i32) {
    %c0_i32 = arith.constant 0 : i32
    %c0_i32_0 = arith.constant 0 : i32
    %c0_i32_1 = arith.constant 0 : i32
    return %c0_i32, %c0_i32_0 : i32, i32
  }
  func.func @transform_23(%arg0: i32) -> (i32, i32) {
    %c0_i32 = arith.constant 0 : i32
    %c0_i32_0 = arith.constant 0 : i32
    %c0_i32_1 = arith.constant 0 : i32
    return %c0_i32, %c0_i32_0 : i32, i32
  }
  func.func @transform_24(%arg0: i32) -> (i32, i32) {
    %c0_i32 = arith.constant 0 : i32
    %c0_i32_0 = arith.constant 0 : i32
    %c0_i32_1 = arith.constant 0 : i32
    return %c0_i32, %c0_i32_0 : i32, i32
  }
}

</mosaic_0001>

<bundles_post_ra>
// kernel: tpu_custom_call.1
= control target key start
LH: loop header
LB: loop body
LE: loop exit
PB: predicated region body
PF: predicated region fallthrough
CT: control target
= control target key end

     0   :  { %s3328_s0 = inlined_call_operand.vmem [shape: f32[16,8], index: 0, kind: input, shape index: {}]   ;;  %s3329_s1 = inlined_call_operand.vmem [shape: f32[16,8], index: 1, kind: input, shape index: {}]   ;;  %s3330_s2 = inlined_call_operand.vmem [shape: f32[48,8], index: 2, kind: input, shape index: {}]   ;;  %s3331_s3 = inlined_call_operand.vmem [shape: s32[48,1], index: 3, kind: input, shape index: {}]   ;;  %s3332_s4 = inlined_call_operand.vmem [shape: s32[1,48], index: 4, kind: input, shape index: {}]   ;;  %s3333_s5 = inlined_call_operand.vmem [shape: f32[8,8], index: 5, kind: input, shape index: {}]   ;;  %s3334_s6 = inlined_call_operand.vmem [shape: f32[1,8], index: 6, kind: input, shape index: {}]   ;;  %s3335_s7 = inlined_call_operand.vmem [shape: f32[8,128], index: 7, kind: input, shape index: {}]   ;;  %s3336_s8 = inlined_call_operand.vmem [shape: f32[8,128], index: 8, kind: input, shape index: {}]   ;;  %s3337_s9 = inlined_call_operand.vmem [shape: f32[1,128], index: 9, kind: input, shape index: {}]   ;;  %s3338_s10 = inlined_call_operand.vmem [shape: f32[8,128], index: 10, kind: input, shape index: {}]   ;;  %s3339_s11 = inlined_call_operand.vmem [shape: f32[1,128], index: 11, kind: input, shape index: {}]   ;;  %s3340_s12 = inlined_call_operand.vmem [shape: f32[3,1,128], index: 12, kind: input, shape index: {}]   ;;  %s3341_s13 = inlined_call_operand.vmem [shape: f32[3,1,128], index: 13, kind: input, shape index: {}]   ;;  %s3342_s14 = inlined_call_operand.hbm [shape: bf16[3,128,256], index: 14, kind: input, shape index: {}]   ;;  %s3343_s15 = inlined_call_operand.vmem [shape: f32[3,1,256], index: 15, kind: input, shape index: {}]   ;;  %s3344_s16 = inlined_call_operand.vmem [shape: f32[3,1,256], index: 16, kind: input, shape index: {}]   ;;  %s3345_s17 = inlined_call_operand.vmem [shape: f32[3,1,256], index: 17, kind: input, shape index: {}]   ;;  %s3346_s18 = inlined_call_operand.hbm [shape: bf16[3,256,128], index: 18, kind: input, shape index: {}]   ;;  %s3347_s19 = inlined_call_operand.vmem [shape: f32[3,1,128], index: 19, kind: input, shape index: {}]   ;;  %s3348_s20 = inlined_call_operand.vmem [shape: f32[1,128], index: 20, kind: input, shape index: {}]   ;;  %s3349_s21 = inlined_call_operand.vmem [shape: f32[1,128], index: 21, kind: input, shape index: {}]   ;;  %s3350_s22 = inlined_call_operand.vmem [shape: bf16[128,128], index: 22, kind: input, shape index: {}]   ;;  %s3351_s23 = inlined_call_operand.vmem [shape: f32[1,128], index: 23, kind: input, shape index: {}]   ;;  %s3352_s24 = inlined_call_operand.hbm [shape: f32[16,128], index: 24, kind: output, shape index: {}]  }
   0x1   :  { %3366 = sst [smem:[#allocation19_spill]] %s3328_s0 }
   0x2   :  { %3367 = sst [smem:[#allocation20_spill]] %s3329_s1 }
   0x3   :  { %3368 = sst [smem:[#allocation21_spill]] %s3330_s2 }
   0x4   :  { %3369 = sst [smem:[#allocation22_spill]] %s3331_s3 }
   0x5   :  { %3370 = sst [smem:[#allocation23_spill]] %s3332_s4 }
   0x6   :  { %3371 = sst [smem:[#allocation24_spill]] %s3333_s5 }
   0x7   :  { %3372 = sst [smem:[#allocation25_spill]] %s3334_s6 }
   0x8   :  { %3373 = sst [smem:[#allocation26_spill]] %s3335_s7 }
   0x9   :  { %3374 = sst [smem:[#allocation27_spill]] %s3336_s8 }
   0xa   :  { %3375 = sst [smem:[#allocation28_spill]] %s3342_s14 }
   0xb   :  { %3376 = sst [smem:[#allocation29_spill]] %s3346_s18 }
   0xc   :  { %3377 = sst [smem:[#allocation30_spill]] %s3348_s20 }
   0xd   :  { %3378 = sst [smem:[#allocation31_spill]] %s3349_s21 }
   0xe   :  { %3379 = sst [smem:[#allocation32_spill]] %s3351_s23 }
   0xf   :  { %3380 = sst [smem:[#allocation33_spill]] %s3352_s24 }
  0x10   :  { %29 = vsyncpa [#allocation7], 0 }
  0x11   :  { %31 = vsyncpa [#allocation7 + $0x1], 0 }
  0x12   :  { %32 = vsyncpa [#allocation10], 0 }
  0x13   :  { %34 = vsyncpa [#allocation10 + $0x1], 0 }
  0x14   :  { %35 = vsyncpa [#allocation8], 0  ;;  %s2874_s5 = smov 0   ;;  %s2876_s26 = smov 0  }
  0x15   :  { %s2878_s27 = smov 0   ;;  %s2880_s28 = smov 0  }
  0x16 LB: > { %3381 = sst [smem:[#allocation15_spill]] %s2723_s26  ;;  %s2893_s6 = sadd.s32 4294967295, %s2731_s28   ;;  %s2731_s28 = sphi %s2880_s28, %s3416_s28   ;;  %s2727_s27 = sphi %s2878_s27, %s3419_s27   ;;  %s2723_s26 = sphi %s2876_s26, %s3418_s26   ;;  %s2719_s5 = sphi %s2874_s5, %s3417_s5  }
  0x17   : > { %3382 = sst [smem:[#allocation16_spill]] %s2727_s27  ;;  %s2896_s2 = sadd.s32 1, %s2731_s28  }
  0x18   : > { %3383 = sst [smem:[#allocation17_spill]] %s2896_s2  ;;  %s349_s29 = ssub.s32 %s2731_s28, %s2896_s2 }
  0x19   : > { %s352_s0 = sadd.s32 1, %s2727_s27  ;;  %p350_p0 = scmp.eq.s32.totalorder %s349_s29, 0 }
  0x1a   : > { %p359_p1 = scmp.ne.s32.totalorder %s2727_s27, %s2723_s26  ;;  %p360_p2 = scmp.eq.s32.totalorder %s2731_s28, 0 }
  0x1b   : > { %p365_p3 = scmp.ne.s32.totalorder %s2723_s26, %s2719_s5  ;;  %p3362_p5 = scmp.eq.s32.totalorder %s2893_s6, 0 }
  0x1c   : > { %s2906_s7 = scalar_select %p350_p0, %s2727_s27, %s352_s0  }
  0x1d   : > { %p361_p4 = por %p360_p2, %p359_p1  ;;  %p2492_p6 = scmp.lt.s32.totalorder %s2731_s28, 3 }
  0x1e   : > { %3384 = sst [smem:[#allocation18_spill]] %s2906_s7  ;;  %p2912_p7 = por %p3362_p5, %p365_p3 }
  0x1f   : > { %s2917_s3 = sand.u32 1, %s2727_s27   ;;  %s3359_s8 = sshll.u32 %s2731_s28, 11 }
  0x20   : > { %s3385_s30 = scalar_select %p2912_p7, 1, 0 }
  0x21   : > { %s3358_s25 = sshll.u32 %s2917_s3, 7  ;;  %s3386_s14 = sld [smem:[#allocation28_spill]] }
  0x22   : > { %s688_s29 = scalar_lea.vmem [#allocation6], %s3358_s25  ;;  %p2932_p8 = pnand %p2492_p6, %p361_p4 }
  0x23   : > { %s695_s0 = sshll.u32 %s688_s29, 4  ;;  %s2930_s0 = int_to_ptr.vmem [resolvable:$true] %s695_s0 }
  0x24   : > { %p2605_p11 = pneg %p2932_p8 }
  0x27   : > { %s2926_s5 = scalar_lea.hbm %s3386_s14, %s3359_s8  ;;  %s2608_s25 = scalar_lea.hbm %s3386_s14, 6144 }
  0x28   : > { %s2603_s4 = scalar_lea.hbm %s2926_s5, 2048  ;;  %p2609_p0 = scmp.lt.u32.totalorder %s2926_s5, %s3386_s14 }
  0x29   : > { %p2604_p10 = scmp.ne.s32.totalorder %s2926_s5, %s2603_s4  ;;  %p2610_p1 = scmp.lt.u32.totalorder %s2608_s25, %s2603_s4 }
  0x2a   : > { %p2612_p3 = scmp.lt.u32.totalorder %s2603_s4, %s2926_s5 }
  0x2b   : > { %p2606_p12 = pnand %p2605_p11, %p2604_p10  ;;  %p2611_p2 = por %p2610_p1, %p2609_p0 }
  0x2d   : > { %p2607_p13 = pneg %p2606_p12  ;;  %p2613_p4 = por %p2612_p3, %p2611_p2 }
  0x2f   : > { %p2614_p6 = pnand %p2613_p4, %p2607_p13 }
  0x31   : > { %2617 = shalt.err (!%p2614_p6)
}
  0x32   : > { %s2618_s27 = scalar_lea.vmem %s2930_s0, 2048  ;;  %s2733_s1 = smov [#allocation6]  }
  0x33   : > { %p2619_p10 = scmp.ne.s32.totalorder %s2930_s0, %s2618_s27  ;;  %s2623_s29 = sshll.u32 %s2733_s1, 4  ;;  %s2624_s29 = int_to_ptr.vmem [resolvable:$false] %s2623_s29 }
  0x34   : > { %s2625_s2 = scalar_lea.vmem %s2624_s29, 4096  ;;  %p2626_p9 = scmp.lt.s32.totalorder %s2930_s0, %s2624_s29 }
  0x35   : > { %p2621_p12 = pnand %p2619_p10, %p2605_p11  ;;  %p2627_p0 = scmp.lt.s32.totalorder %s2625_s2, %s2618_s27 }
  0x37   : > { %p2622_p5 = pneg %p2621_p12  ;;  %p2628_p1 = por %p2627_p0, %p2626_p9 }
  0x39   : > { %p2629_p2 = pnand %p2628_p1, %p2622_p5 }
  0x3b   : > { %2632 = shalt.err (!%p2629_p2)
}
  0x3c   : > { %s2734_s25 = smov 128   ;;  %s2735_s8 = smov 8  }
  0x3d   : > { %s3388_s4 = scalar_lea.sflag [#allocation7], %s2917_s3  ;;  %p751_p13 = scmp.lt.s32.totalorder %s2731_s28, 4 }
  0x3e   : > { %2488 = dma.hbm_to_vmem [thread:$0]  (!%p2932_p8), %s2926_s5, 2048, %s2930_s0, %s3388_s4, %s2734_s25, %s2734_s25, %s2735_s8  }
  0x3f   : > { %s3389_s27 = sshll.u32 %s2731_s28, 11  ;;  %s3390_s18 = sld [smem:[#allocation29_spill]] }
  0x40   : > { %p3391_p5 = scmp.ge.s32.totalorder %s2731_s28, 1  ;;  %s3393_s24 = sshll.u32 %s2917_s3, 7 }
  0x41   : > { %s730_s23 = scalar_lea.vmem [#allocation9], %s3393_s24  ;;  %s727_s5 = scalar_lea.sflag [#allocation10], %s2917_s3 }
  0x42   : > { %p2975_p9 = pnand %p3391_p5, %p751_p13  ;;  %s737_s21 = sshll.u32 %s730_s23, 4  ;;  %s2981_s21 = int_to_ptr.vmem [resolvable:$true] %s737_s21 }
  0x45   : > { %s2971_s2 = scalar_lea.hbm %s3390_s18, %s3389_s27  ;;  %s2638_s8 = scalar_lea.hbm %s3390_s18, 6144 }
  0x46   : > { %s2633_s0 = scalar_lea.hbm %s2971_s2, 2048  ;;  %p2639_p10 = scmp.lt.u32.totalorder %s2971_s2, %s3390_s18 }
  0x47   : > { %p2634_p3 = scmp.ne.s32.totalorder %s2971_s2, %s2633_s0  ;;  %p2640_p12 = scmp.lt.u32.totalorder %s2638_s8, %s2633_s0 }
  0x48   : > { %p2642_p1 = scmp.lt.u32.totalorder %s2633_s0, %s2971_s2 }
  0x49   : > { %p2636_p4 = pnand %p2634_p3, %p2605_p11  ;;  %p2641_p0 = por %p2640_p12, %p2639_p10 }
  0x4b   : > { %p2637_p6 = pneg %p2636_p4  ;;  %p2643_p2 = por %p2642_p1, %p2641_p0 }
  0x4d   : > { %p2644_p13 = pnand %p2643_p2, %p2637_p6 }
  0x4f   : > { %2647 = shalt.err (!%p2644_p13)
}
  0x50   : > { %s2648_s23 = scalar_lea.vmem %s2981_s21, 2048  ;;  %s2736_s24 = smov [#allocation9]  }
  0x51   : > { %p2649_p5 = scmp.ne.s32.totalorder %s2981_s21, %s2648_s23  ;;  %s2653_s1 = sshll.u32 %s2736_s24, 4  ;;  %s2654_s1 = int_to_ptr.vmem [resolvable:$false] %s2653_s1 }
  0x52   : > { %s2655_s29 = scalar_lea.vmem %s2654_s1, 4096  ;;  %p2656_p7 = scmp.lt.s32.totalorder %s2981_s21, %s2654_s1 }
  0x53   : > { %p2651_p3 = pnand %p2649_p5, %p2605_p11  ;;  %p2657_p10 = scmp.lt.s32.totalorder %s2655_s29, %s2648_s23 }
  0x55   : > { %p2652_p4 = pneg %p2651_p3  ;;  %p2658_p12 = por %p2657_p10, %p2656_p7 }
  0x57   : > { %p2659_p0 = pnand %p2658_p12, %p2652_p4 }
  0x59   : > { %2662 = shalt.err (!%p2659_p0)
}
  0x5a   : > { %s2737_s0 = smov 64   ;;  %s2738_s28 = smov 4  }
  0x5b   : > { %2491 = dma.hbm_to_vmem [thread:$0]  (!%p2932_p8), %s2971_s2, 2048, %s2981_s21, %s727_s5, %s2737_s0, %s2737_s0, %s2738_s28  }
  0x5c   : > { %755 = sbr.rel (%p2975_p9) target bundleno = 2666 (0xa6a), region = 116  ;;  %s757_s25 = sand.u32 (!%p2975_p9), 1, %s2723_s26  }
  0x5d   : > { %s2263_s8 = sshll.u32 (!%p2975_p9), %s757_s25, 7  ;;  %s758_s4 = scalar_lea.sflag (!%p2975_p9), [#allocation7], %s757_s25 }
  0x5e   : > { %s3012_s27 = scalar_lea.vmem (!%p2975_p9), [#allocation6], %s2263_s8  ;;  %p3394_p7 = scmp.ne.s32.totalorder (!%p2975_p9), %s3385_s30, 0 }
  0x63   : > { %2706 = dma.done.wait (%p3394_p7), %s758_s4, 2048  }
  0x64   : > { %2708 = vsyncadd (%p3394_p7), %s758_s4, 4294965248  ;;  %s767_s23 = scalar_lea.sflag [#allocation10], %s757_s25  ;;  %s3018_s7 = scalar_lea.vmem [#allocation9], %s2263_s8 }
  0x65   : > { %2710 = dma.done.wait (%p3394_p7), %s767_s23, 2048  }
  0x66   : > { %2712 = vsyncadd (%p3394_p7), %s767_s23, 4294965248  ;;  %p856_p8 = scmp.lt.s32.totalorder %s2893_s6, 2  ;;  %p2268_p11 = scmp.ne.s32.totalorder %s2893_s6, 0 }
  0x67   : > { %s3395_s1 = sld [smem:[#allocation24_spill]] (!%p2268_p11)  ;;  %s3396_s26 = sld [smem:[#allocation19_spill]] (!%p2268_p11)  ;;  %vm892_vm0 = vcmask (!%p2268_p11), 64512   ;;  %v1157_v4 = vld [vmem:[%s3338_s10] sm:$0xff] (!%p2268_p11)  ;;  %v2739_v14 = vmov (!%p2268_p11), 0   ;;  %v1284_v15 = vlaneseq (!%p2268_p11)  ;;  %v2740_v21 = vmov (!%p2268_p11), 0.0  }
  0x68   : > { %s3026_s14 = scalar_select %p856_p8, %s2893_s6, 2 }
  0x69   : > { %881 = sbr.rel (%p2268_p11) target bundleno = 552 (0x228), region = 128  ;;  %s3398_s21 = sld [smem:[#allocation27_spill]] (!%p2268_p11)  ;;  %2420 = vmatprep.subr.mxu0 (!%p2268_p11), %v1157_v4  ;;  %2542 = vset.pattern.permute.xlu1 (!%p2268_p11), %v2739_v14  ;;  %v1336_v19 = vshrl.u32 (!%p2268_p11), %v1284_v15, 7  ;;  %vm1350_vm3 = vcmask (!%p2268_p11), 392192   ;;  %v1285_v34 = vand.u32 (!%p2268_p11), 127, %v1284_v15  ;;  %vm1331_vm8 = vcmask (!%p2268_p11), 130048  }
  0x6a   : > { %s3037_s29 = sshll.u32 %s3026_s14, 1  ;;  %s3399_s28 = sld [smem:[#allocation21_spill]] (!%p2268_p11)  ;;  %2421 = vmatpush3.msra.mxu0 (!%p2268_p11), %v1157_v4  ;;  %2541 = vset.pattern.permute.xlu0 (!%p2268_p11), %v2739_v14  ;;  %v2277_v50 = vld [vmem:[%s3339_s11] ss:$0 sm:$0xff] (!%p2268_p11) }
  0x6b   : > { %s865_s4 = scalar_lea.vmem %s3343_s15, %s3037_s29  ;;  %s869_s3 = scalar_lea.vmem %s3344_s16, %s3037_s29  ;;  %v1337_v20 = vadd.s32 (!%p2268_p11), 8, %v1336_v19  ;;  %v2276_v63 = vld [vmem:[%s3337_s9] ss:$0 sm:$0xff] (!%p2268_p11) }
  0x6c   : > { %s873_s24 = scalar_lea.vmem %s3345_s17, %s3037_s29  ;;  %s3401_s23 = sld [smem:[#allocation26_spill]] (!%p2268_p11) }
  0x6d   : > { %v884_v0 = vld [vmem:[%s3395_s1] sm:$0xff] (!%p2268_p11)  ;;  %s3397_s20 = smov (!%p2268_p11), %s3396_s26  ;;  %s3405_s8 = sld [smem:[#allocation20_spill]] (!%p2268_p11) }
  0x6e   : > { %v882_v1 = vld [vmem:[%s3396_s26] sm:$0xff] (!%p2268_p11)  ;;  %v883_v2 = vld [vmem:[%s3397_s20 + $0x8] sm:$0xff] (!%p2268_p11)  ;;  %2405 = vmatprep.subr.mxu1 (!%p2268_p11), %v884_v0  ;;  %s3403_s26 = sld [smem:[#allocation23_spill]] (!%p2268_p11) }
  0x6f   : > { %2407 = vmatprep.mubr.msk.f32.mxu1 (!%p2268_p11), %vm892_vm0, %v882_v1  ;;  %2406 = vmatpush3.msra.mxu1 (!%p2268_p11), %v884_v0  ;;  %v977_v3 = vld [vmem:[%s3398_s21] sm:$0xff] (!%p2268_p11) }
  0x70   : > { %2408 = vmatmul.mubr.msk.f32.vlgmr.msra.gmra.mrb[0].mxu1 %vm892_vm0, %v883_v2  ;;  %2410 = vmatprep.subr.mxu1 %v977_v3  ;;  %s3400_s30 = smov %s3399_s28  ;;  %v1151_v5 = vld [vmem:[%s3399_s28] sm:$0xff]  ;;  %s3404_s28 = sld [smem:[#allocation25_spill]] }
  0x71   : > { %2411 = vmatpush3.msra.mxu1 %v977_v3  ;;  %v1152_v6 = vld [vmem:[%s3400_s30 + $0x8] sm:$0xff]  ;;  %2422 = vmatprep.mubr.msk.f32.mxu0 %vm892_vm0, %v1151_v5  ;;  %v1153_v8 = vld [vmem:[%s3400_s30 + $0x10] sm:$0xff]  ;;  %v1154_v9 = vld [vmem:[%s3400_s30 + $0x18] sm:$0xff] }
  0x72   : > { %v976_v7 = vld [vmem:[%s3401_s23] sm:$0xff]  ;;  %2423 = vmatmul.mubr.msk.f32.vlgmr.msra.gmra.mrb[0].mxu0 %vm892_vm0, %v1152_v6  ;;  %v1156_v11 = vld [vmem:[%s3400_s30 + $0x28] sm:$0xff]  ;;  %s3402_s23 = sld [smem:[#allocation22_spill]] }
  0x73   : > { %2415 = vmatprep.subr.mxu1 %v976_v7  ;;  %2425 = vmatprep.mubr.msk.f32.mxu0 %vm892_vm0, %v1153_v8  ;;  %v1155_v10 = vld [vmem:[%s3400_s30 + $0x20] sm:$0xff]  ;;  %v975_v33 = vld [vmem:[%s3405_s8 + $0x8] sm:$0xff] }
  0x74   : > { %v2290_v16 = vld [vmem:[%s3403_s26] ss:$0 sm:$0xff] }
  0x75   : > { %vm1343_vm1 = vcmp.eq.s32.totalorder %v1336_v19, %v2290_v16  ;;  %vm1344_vm2 = vcmp.eq.s32.totalorder %v1337_v20, %v2290_v16  ;;  %v974_v32 = vld [vmem:[%s3405_s8] sm:$0xff] }
  0x76   : > { %2426 = vmatmul.mubr.msk.f32.gmra.mrb[2].mxu0 %vm892_vm0, %v1154_v9  ;;  %v2291_v22 = vsel %vm1343_vm1, 1.0, %v2740_v21  ;;  %v2292_v25 = vsel %vm1344_vm2, 1.0, %v2740_v21  ;;  %v2269_v27 = vld [vmem:[%s3404_s28] ss:$0 sm:$0xff] }
  0x77   : > { %2428 = vmatprep.mubr.msk.f32.mxu0 %vm892_vm0, %v1155_v10  ;;  %v1349_v26 = vpack.c.bf16 %v2292_v25, %v2291_v22 }
  0x78   : > { %v1288_v12 = vld [vmem:[%s3402_s23 + $0x10] sm:$0xff]  ;;  %v1286_v13 = vld [vmem:[%s3402_s23] sm:$0xff]  ;;  %v1289_v17 = vld [vmem:[%s3402_s23 + $0x18] sm:$0xff] }
  0x79   : > { %1299 = vperm.xlu1 %2542, %v1288_v12   ;;  %1293 = vperm.xlu0 %2541, %v1286_v13   ;;  %v1287_v18 = vld [vmem:[%s3402_s23 + $0x8] sm:$0xff]  ;;  %v1290_v24 = vld [vmem:[%s3402_s23 + $0x20] sm:$0xff]  ;;  %1351 = vst.msk [vmem:[#allocation5] sm:$0xff] %vm1350_vm3, %v1349_v26 }
  0x7a   : > { %2429 = vmatmul.mubr.msk.f32.gmra.mrb[4].mxu0 %vm892_vm0, %v1156_v11  ;;  %v1291_v23 = vld [vmem:[%s3402_s23 + $0x28] sm:$0xff] }
  0x7d   : > { %1302 = vperm.xlu1 %2542, %v1289_v17   ;;  %1296 = vperm.xlu0 %2541, %v1287_v18  }
  0x81   : > { %1308 = vperm.xlu1 %2542, %v1291_v23   ;;  %1305 = vperm.xlu0 %2541, %v1290_v24  }
  0xf8   : > { %v1300_v35 = vpop.permute.xlu1 %1299  ;;  %v1294_v36 = vpop.permute.xlu0 %1293 }
  0xf9   : > { %vm1312_vm4 = vcmp.eq.s32.totalorder %v1285_v34, %v1300_v35  ;;  %vm1310_vm5 = vcmp.eq.s32.totalorder %v1285_v34, %v1294_v36 }
  0xfa   : > { %v2286_v37 = vsel %vm1312_vm4, 1.0, %v2740_v21  ;;  %v2284_v38 = vsel %vm1310_vm5, 1.0, %v2740_v21 }
  0xfc   : > { %v1303_v39 = vpop.permute.xlu1 %1302  ;;  %v1297_v40 = vpop.permute.xlu0 %1296 }
  0xfd   : > { %vm1313_vm6 = vcmp.eq.s32.totalorder %v1285_v34, %v1303_v39  ;;  %vm1311_vm7 = vcmp.eq.s32.totalorder %v1285_v34, %v1297_v40 }
  0xfe   : > { %v2287_v41 = vsel %vm1313_vm6, 1.0, %v2740_v21  ;;  %v2285_v42 = vsel %vm1311_vm7, 1.0, %v2740_v21 }
  0xff   : > { %v1329_v43 = vpack.c.bf16 %v2287_v41, %v2286_v37  ;;  %v1328_v44 = vpack.c.bf16 %v2285_v42, %v2284_v38 }
 0x100   : > { %v1309_v45 = vpop.permute.xlu1 %1308  ;;  %v1306_v46 = vpop.permute.xlu0 %1305 }
 0x101   : > { %1333 = vst.msk [vmem:[#allocation4 + $0x8] sm:$0xff] %vm1331_vm8, %v1329_v43  ;;  %1332 = vst.msk [vmem:[#allocation4] sm:$0xff] %vm1331_vm8, %v1328_v44  ;;  %vm1315_vm9 = vcmp.eq.s32.totalorder %v1285_v34, %v1309_v45  ;;  %vm1314_vm10 = vcmp.eq.s32.totalorder %v1285_v34, %v1306_v46 }
 0x102   : > { %v2289_v47 = vsel %vm1315_vm9, 1.0, %v2740_v21  ;;  %v2288_v48 = vsel %vm1314_vm10, 1.0, %v2740_v21 }
 0x103   : > { %v1330_v49 = vpack.c.bf16 %v2289_v47, %v2288_v48 }
 0x105   : > { %1334 = vst.msk [vmem:[#allocation4 + $0x10] sm:$0xff] %vm1331_vm8, %v1330_v49 }
 0x143   : > { %v2409_v28 = vpop.f32.mrb[0].mxu1 }
 0x144   : > { %v965_v29 = vpop.f32.mrb[1].mxu1  ;;  %v971_v31 = vadd.f32 %v2409_v28, %v2269_v27 }
 0x145   : > { %v966_v30 = vadd.f32 %v2269_v27, %v965_v29  ;;  %v2424_v51 = vpop.f32.mrb[0].mxu0 }
 0x146   : > { %v1255_v52 = vadd.f32 %v2424_v51, %v2277_v50  ;;  %v1249_v53 = vpop.f32.mrb[1].mxu0 }
 0x147   : > { %2412 = vmatprep.mubr.msk.f32.mxu1 %vm892_vm0, %v966_v30  ;;  %v1250_v54 = vadd.f32 %v2277_v50, %v1249_v53 }
 0x148   : > { %2413 = vmatmul.mubr.msk.f32.vlgmr.msra.gmra.mrb[2].mxu1 %vm892_vm0, %v971_v31  ;;  %1279 = vst [vmem:[#allocation3 + $0x8] sm:$0xff] %v1255_v52 }
 0x149   : > { %2416 = vmatpush3.msra.mxu1 %v976_v7  ;;  %2417 = vmatprep.mubr.msk.f32.mxu1 %vm892_vm0, %v974_v32  ;;  %1278 = vst [vmem:[#allocation3] sm:$0xff] %v1250_v54  ;;  %v2427_v55 = vpop.f32.mrb[2].mxu0 }
 0x14a   : > { %v1265_v56 = vadd.f32 %v2427_v55, %v2277_v50  ;;  %v1259_v57 = vpop.f32.mrb[3].mxu0 }
 0x14b   : > { %v1260_v58 = vadd.f32 %v2277_v50, %v1259_v57 }
 0x14c   : > { %1281 = vst [vmem:[#allocation3 + $0x18] sm:$0xff] %v1265_v56 }
 0x14d   : > { %1280 = vst [vmem:[#allocation3 + $0x10] sm:$0xff] %v1260_v58  ;;  %v2430_v59 = vpop.f32.mrb[4].mxu0 }
 0x14e   : > { %v1275_v60 = vadd.f32 %v2430_v59, %v2277_v50  ;;  %v1269_v61 = vpop.f32.mrb[5].mxu0 }
 0x14f   : > { %v1270_v62 = vadd.f32 %v2277_v50, %v1269_v61 }
 0x150   : > { %2418 = vmatmul.mubr.msk.f32.vlgmr.msra.gmra.mrb[2].mxu1 %vm892_vm0, %v975_v33  ;;  %1283 = vst [vmem:[#allocation3 + $0x28] sm:$0xff] %v1275_v60 }
 0x151   : > { %1282 = vst [vmem:[#allocation3 + $0x20] sm:$0xff] %v1270_v62 }
 0x223   : > { %v2419_v0 = vpop.f32.mrb[2].mxu1 }
 0x224   : > { %v1148_v1 = vadd.f32 %v2419_v0, %v2276_v63  ;;  %v1131_v2 = vpop.f32.mrb[3].mxu1 }
 0x225   : > { %v1147_v3 = vadd.f32 %v2276_v63, %v1131_v2 }
 0x226   : > { %1150 = vst [vmem:[#allocation2 + $0x8] sm:$0xff] %v1148_v1 }
 0x227   : > { %1149 = vst [vmem:[#allocation2] sm:$0xff] %v1147_v3 }
 0x228 PF: > { %v2741_v14 = vmov 0.0   ;;  %vm2742_vm11 = vmmov 0   ;;  %s3406_s25 = scalar_lea.vmem %s3340_s12, %s3026_s14  ;;  %s3407_s1 = scalar_lea.vmem %s3341_s13, %s3026_s14  ;;  %v1402_v38 = vld [vmem:[#allocation4] sm:$0xff]  ;;  %vm1412_vm13 = vcmask 130048   ;;  %v1403_v39 = vld [vmem:[#allocation4 + $0x8] sm:$0xff]  ;;  %v1404_v40 = vld [vmem:[#allocation4 + $0x10] sm:$0xff] }
 0x229   : > { %2431 = vmatprep.subr.bf16.mxu0 %v2741_v14  ;;  %2445 = vmatprep.subr.bf16.mxu1 %v2741_v14  ;;  %v2293_v22 = vld [vmem:[%s3406_s25] ss:$0 sm:$0xff]  ;;  %p3408_p9 = scmp.eq.s32.totalorder %s2893_s6, 0  ;;  %v2545_v42 = vld [vmem:[%s3012_s27 + $0x4] ss:$8 sps:$4 sm:$0xff]   ;;  %v1406_v55 = vld [vmem:[#allocation3] sm:$0xff] }
 0x22a   : > { %2433 = vmatprep.mubr.msk.bf16.mxu0 %vm2742_vm11, %v2741_v14  ;;  %2451 = vmatprep.mubr.msk.bf16.mxu1 %vm2742_vm11, %v2741_v14  ;;  %v2294_v24 = vld [vmem:[%s3407_s1] ss:$0 sm:$0xff]  ;;  %v2548_v43 = vld [vmem:[%s3012_s27 + $0x14] ss:$8 sps:$4 sm:$0xff]   ;;  %v2546_v44 = vld [vmem:[%s3012_s27 + $0x10] ss:$8 sps:$4 sm:$0xff]  }
 0x22b   : > { %s1397_s5 = scalar_select %p3408_p9, 1, 0  ;;  %v2543_v41 = vld [vmem:[%s3012_s27] ss:$8 sps:$4 sm:$0xff]   ;;  %v2551_v45 = vld [vmem:[%s3012_s27 + $0x24] ss:$8 sps:$4 sm:$0xff]  }
 0x22c   : > { %v2549_v46 = vld [vmem:[%s3012_s27 + $0x20] ss:$8 sps:$4 sm:$0xff]   ;;  %v2554_v47 = vld [vmem:[%s3012_s27 + $0x34] ss:$8 sps:$4 sm:$0xff]   ;;  %v2552_v48 = vld [vmem:[%s3012_s27 + $0x30] ss:$8 sps:$4 sm:$0xff]  }
 0x22d   : > { %v3142_v5 = vld [vmem:[#allocation2 + $0x8] sm:$0xff]  ;;  %v1398_v30 = vstv %s1397_s5  ;;  %v2560_v51 = vld [vmem:[%s3012_s27 + $0x54] ss:$8 sps:$4 sm:$0xff]   ;;  %v2558_v52 = vld [vmem:[%s3012_s27 + $0x50] ss:$8 sps:$4 sm:$0xff]   ;;  %vm1495_vm14 = vcmask 392192  }
 0x22e   : > { %v3140_v4 = vld [vmem:[#allocation2] sm:$0xff]  ;;  %vm3166_vm12 = vcmp.eq.s32.totalorder %v1398_v30, 1  ;;  %v1407_v57 = vld [vmem:[#allocation3 + $0x8] sm:$0xff]  ;;  %p2332_p6 = scmp.ne.s32.totalorder %s2893_s6, 2 }
 0x22f   : > { %1356 = vadd.xlane.f32.xlu0 %v3140_v4  ;;  %v2557_v49 = vld [vmem:[%s3012_s27 + $0x44] ss:$8 sps:$4 sm:$0xff]   ;;  %v2555_v50 = vld [vmem:[%s3012_s27 + $0x40] ss:$8 sps:$4 sm:$0xff]   ;;  %vm2745_vm15 = vmmov (!%p2332_p6), 0   ;;  %s3412_s25 = sld [smem:[#allocation30_spill]] (!%p2332_p6) }
 0x230   : > { %v2563_v53 = vld [vmem:[%s3012_s27 + $0x64] ss:$8 sps:$4 sm:$0xff]   ;;  %v2561_v54 = vld [vmem:[%s3012_s27 + $0x60] ss:$8 sps:$4 sm:$0xff]   ;;  %s3413_s1 = sld [smem:[#allocation31_spill]] (!%p2332_p6)  ;;  %s3414_s18 = sld [smem:[#allocation32_spill]] (!%p2332_p6) }
 0x231   : > { %v1408_v1 = vld [vmem:[#allocation3 + $0x10] sm:$0xff] }
 0x233   : > { %1358 = vadd.xlane.f32.xlu0 %v3142_v5 }
 0x2bc   : > { %v1357_v6 = vpop.xlane.xlu0 %1356 }
 0x2bd   : > { %v1361_v7 = vmul.f32 0.0078125, %v1357_v6 }
 0x2bf   : > { %v1363_v8 = vsub.f32 %v3140_v4, %v1361_v7  ;;  %v1409_v7 = vld [vmem:[#allocation3 + $0x18] sm:$0xff] }
 0x2c0   : > { %v1359_v9 = vpop.xlane.xlu0 %1358 }
 0x2c1   : > { %v1362_v10 = vmul.f32 0.0078125, %v1359_v9  ;;  %v1365_v11 = vmul.f32 %v1363_v8, %v1363_v8 }
 0x2c3   : > { %v1364_v12 = vsub.f32 %v3142_v5, %v1362_v10  ;;  %1367 = vadd.xlane.f32.xlu1 %v1365_v11 }
 0x2c5   : > { %v1366_v13 = vmul.f32 %v1364_v12, %v1364_v12 }
 0x2c7   : > { %1369 = vadd.xlane.f32.xlu1 %v1366_v13 }
 0x350   : > { %v1368_v15 = vpop.xlane.xlu1 %1367 }
 0x351   : > { %v1371_v16 = vmul.f32 0.0078125, %v1368_v15 }
 0x353   : > { %v1373_v17 = vadd.f32 1e-05, %v1371_v16 }
 0x354   : > { %v1370_v18 = vpop.xlane.xlu1 %1369 }
 0x355   : > { %2583 = vrsqrt.f32 %v1373_v17  ;;  %v1372_v19 = vmul.f32 0.0078125, %v1370_v18  ;;  %v1410_v17 = vld [vmem:[#allocation3 + $0x20] sm:$0xff] }
 0x357   : > { %v1374_v20 = vadd.f32 1e-05, %v1372_v19 }
 0x359   : > { %2585 = vrsqrt.f32 %v1374_v20 }
 0x35f   : > { %v2584_v21 = vpop.eup %2583 }
 0x360   : > { %v1377_v23 = vmul.f32 %v2584_v21, %v1363_v8  ;;  %v1411_v21 = vld [vmem:[#allocation3 + $0x28] sm:$0xff] }
 0x362   : > { %v1385_v25 = vmul.f32 %v2293_v22, %v1377_v23 }
 0x363   : > { %v2586_v26 = vpop.eup %2585 }
 0x364   : > { %v1378_v27 = vmul.f32 %v2586_v26, %v1364_v12  ;;  %v1393_v28 = vadd.f32 %v2294_v24, %v1385_v25 }
 0x366   : > { %v1386_v29 = vmul.f32 %v2293_v22, %v1378_v27  ;;  %v1395_v32 = vmax.f32 %v1393_v28, 0.0 }
 0x368   : > { %v1394_v31 = vadd.f32 %v2294_v24, %v1386_v29  ;;  %v3173_v35 = vsel %vm3166_vm12, %v3140_v4, %v1395_v32 }
 0x36a   : > { %v1396_v34 = vmax.f32 %v1394_v31, 0.0 }
 0x36c   : > { %v3178_v36 = vsel %vm3166_vm12, %v3142_v5, %v1396_v34  ;;  %v1491_v34 = vld [vmem:[#allocation5] sm:$0xff] }
 0x36d   : > { %v1405_v37 = vpack.c.bf16 %v3178_v36, %v3173_v35 }
 0x36f   : > { %2432 = vmatpush3.bf16.msra.mxu0 %v1405_v37  ;;  %v2566_v37 = vld [vmem:[%s3012_s27 + $0x74] ss:$8 sps:$4 sm:$0xff]  }
 0x370   : > { %1651 = vmatprep.subr.bf16.mxu0 %v2545_v42 }
 0x372   : > { %2434 = vmatmul.mubr.msk.bf16.vlgmr.msra.gmra.mrb[0].mxu0 %vm1412_vm13, %v1402_v38  ;;  %v2564_v38 = vld [vmem:[%s3012_s27 + $0x70] ss:$8 sps:$4 sm:$0xff]  }
 0x373   : > { %2437 = vmatprep.mubr.msk.bf16.mxu0 %vm2742_vm11, %v2741_v14  ;;  %1652 = vmatpush1.bf16.msra.mxu0 %v2543_v41 }
 0x374   : > { %1653 = vmatprep.subr.bf16.mxu0 %v2548_v43 }
 0x377   : > { %1654 = vmatpush1.bf16.msra.mxu0 %v2546_v44 }
 0x378   : > { %1655 = vmatprep.subr.bf16.mxu0 %v2551_v45 }
 0x37a   : > { %2438 = vmatmul.mubr.msk.bf16.gmra.mrb[4].mxu0 %vm1412_vm13, %v1403_v39  ;;  %v2743_v39 = vmov 0  }
 0x37b   : > { %2441 = vmatprep.mubr.msk.bf16.mxu0 %vm2742_vm11, %v2741_v14  ;;  %1656 = vmatpush1.bf16.msra.mxu0 %v2549_v46  ;;  %v1561_v46 = vlaneseq }
 0x37c   : > { %1657 = vmatprep.subr.bf16.mxu0 %v2554_v47 }
 0x37d   : > { %v1562_v47 = vshrl.u32 %v1561_v46, 7 }
 0x37f   : > { %1658 = vmatpush1.bf16.msra.mxu0 %v2552_v48  ;;  %v3206_v48 = vsub.s32 0, %v1562_v47 }
 0x380   : > { %1659 = vmatprep.subr.bf16.mxu0 %v2557_v49  ;;  %v1559_v49 = vld [vmem:[%s865_s4] sm:$0x3] }
 0x382   : > { %2442 = vmatmul.mubr.msk.bf16.gmra.mrb[8].mxu0 %vm1412_vm13, %v1404_v40 }
 0x383   : > { %1660 = vmatpush1.bf16.msra.mxu0 %v2555_v50  ;;  %1683 = vmatprep.mubr.bf16.mxu0 %v2743_v39  ;;  %v3213_v50 = vsub.s32 1, %v1562_v47  ;;  %v1694_v39 = vld [vmem:[%s869_s3] sm:$0x3]  ;;  %s3411_s3 = scalar_lea.vmem %s3347_s19, %s3026_s14 }
 0x384   : > { %1661 = vmatprep.subr.bf16.mxu0 %v2560_v51 }
 0x387   : > { %1662 = vmatpush1.bf16.msra.mxu0 %v2558_v52 }
 0x388   : > { %1663 = vmatprep.subr.bf16.mxu0 %v2563_v53 }
 0x38b   : > { %1664 = vmatpush1.bf16.msra.mxu0 %v2561_v54 }
 0x38c   : > { %1665 = vmatprep.subr.bf16.mxu0 %v2566_v37 }
 0x38f   : > { %1666 = vmatpush1.bf16.msra.mxu0 %v2564_v38 }
 0x445   : > { %v1456_v56 = vpop.f32.mrb[0].mxu0 }
 0x446   : > { %v1457_v58 = vadd.f32 %v1456_v56, %v1406_v55  ;;  %v2435_v59 = vpop.f32.mrb[1].mxu0 }
 0x447   : > { %v1459_v60 = vpop.f32.mrb[2].mxu0 }
 0x448   : > { %v1479_v61 = vmax.f32 %v1457_v58, 0.0  ;;  %v1460_v62 = vadd.f32 %v1459_v60, %v1407_v57  ;;  %v2436_v63 = vpop.f32.mrb[3].mxu0 }
 0x44a   : > { %v1480_v0 = vmax.f32 %v1460_v62, 0.0  ;;  %v1485_v2 = vadd.f32 1e-07, %v1479_v61  ;;  %v2567_v61 = vld [vmem:[%s3018_s7 + $0x40] sm:$0xff]  }
 0x44b   : > { %v2568_v62 = vld [vmem:[%s3018_s7] sm:$0xff]  }
 0x44c   : > { %v1486_v3 = vadd.f32 1e-07, %v1480_v0 }
 0x44d   : > { %v1464_v6 = vpop.f32.mrb[4].mxu0 }
 0x44e   : > { %v1465_v8 = vadd.f32 %v1464_v6, %v1408_v1  ;;  %v2439_v9 = vpop.f32.mrb[5].mxu0  ;;  %v1492_v10 = vpack.c.bf16 %v1486_v3, %v1485_v2 }
 0x44f   : > { %v1467_v11 = vpop.f32.mrb[6].mxu0 }
 0x450   : > { %v1481_v12 = vmax.f32 %v1465_v8, 0.0  ;;  %v1468_v13 = vadd.f32 %v1467_v11, %v1409_v7  ;;  %v2440_v15 = vpop.f32.mrb[7].mxu0  ;;  %2446 = vmatpush3.bf16.msra.mxu1 %v1492_v10 }
 0x451   : > { %2447 = vmatprep.subr.bf16.mxu1 %v2741_v14 }
 0x452   : > { %v1482_v16 = vmax.f32 %v1468_v13, 0.0  ;;  %v1487_v18 = vadd.f32 1e-07, %v1481_v12 }
 0x454   : > { %v1488_v19 = vadd.f32 1e-07, %v1482_v16  ;;  %v2569_v16 = vld [vmem:[%s3018_s7 + $0x48] sm:$0xff]  }
 0x455   : > { %v1472_v20 = vpop.f32.mrb[8].mxu0 }
 0x456   : > { %v1493_v22 = vpack.c.bf16 %v1488_v19, %v1487_v18  ;;  %v1473_v23 = vadd.f32 %v1472_v20, %v1410_v17  ;;  %v2443_v24 = vpop.f32.mrb[9].mxu0  ;;  %v2570_v17 = vld [vmem:[%s3018_s7 + $0x8] sm:$0xff]   ;;  %v2571_v18 = vld [vmem:[%s3018_s7 + $0x50] sm:$0xff]   ;;  %v2573_v20 = vld [vmem:[%s3018_s7 + $0x58] sm:$0xff]  }
 0x457   : > { %v1475_v25 = vpop.f32.mrb[10].mxu0  ;;  %v2572_v19 = vld [vmem:[%s3018_s7 + $0x10] sm:$0xff]   ;;  %v2577_v24 = vld [vmem:[%s3018_s7 + $0x68] sm:$0xff]  }
 0x458   : > { %v1483_v26 = vmax.f32 %v1473_v23, 0.0  ;;  %v1476_v27 = vadd.f32 %v1475_v25, %v1411_v21  ;;  %v2444_v28 = vpop.f32.mrb[11].mxu0  ;;  %2448 = vmatpush3.bf16.msra.mxu1 %v1493_v22  ;;  %v2574_v21 = vld [vmem:[%s3018_s7 + $0x18] sm:$0xff]   ;;  %v2575_v22 = vld [vmem:[%s3018_s7 + $0x60] sm:$0xff]   ;;  %v2578_v25 = vld [vmem:[%s3018_s7 + $0x28] sm:$0xff]  }
 0x459   : > { %2449 = vmatprep.subr.bf16.mxu1 %v2741_v14  ;;  %v2576_v23 = vld [vmem:[%s3018_s7 + $0x20] sm:$0xff]   ;;  %v2581_v28 = vld [vmem:[%s3018_s7 + $0x78] sm:$0xff]  }
 0x45a   : > { %v1484_v29 = vmax.f32 %v1476_v27, 0.0  ;;  %v1489_v30 = vadd.f32 1e-07, %v1483_v26  ;;  %v2579_v26 = vld [vmem:[%s3018_s7 + $0x70] sm:$0xff]  }
 0x45b   : > { %v2580_v27 = vld [vmem:[%s3018_s7 + $0x30] sm:$0xff]  }
 0x45c   : > { %v1490_v31 = vadd.f32 1e-07, %v1484_v29  ;;  %v2582_v29 = vld [vmem:[%s3018_s7 + $0x38] sm:$0xff]  }
 0x45e   : > { %v1494_v32 = vpack.c.bf16 %v1490_v31, %v1489_v30 }
 0x460   : > { %2450 = vmatpush3.bf16.msra.mxu1 %v1494_v32 }
 0x461   : > { %2374 = vmatprep.subr.bf16.mxu1 %v2567_v61 }
 0x463   : > { %2452 = vmatmul.mubr.msk.bf16.vlgmr.msra.gmra.mrb[0].mxu1 %vm1495_vm14, %v1491_v34 }
 0x464   : > { %2375 = vmatpush3.bf16.msra.mxu1 %v2568_v62 }
 0x465   : > { %2376 = vmatprep.subr.bf16.mxu1 %v2569_v16 }
 0x468   : > { %2377 = vmatpush3.bf16.msra.mxu1 %v2570_v17 }
 0x469   : > { %2378 = vmatprep.subr.bf16.mxu1 %v2571_v18 }
 0x46c   : > { %2379 = vmatpush3.bf16.msra.mxu1 %v2572_v19 }
 0x46d   : > { %2380 = vmatprep.subr.bf16.mxu1 %v2573_v20 }
 0x470   : > { %2381 = vmatpush3.bf16.msra.mxu1 %v2574_v21  ;;  %v2592_v21 = vld [vmem:[%s3350_s22 + $0x8] sm:$0xff] (!%p2332_p6)  }
 0x471   : > { %2382 = vmatprep.subr.bf16.mxu1 %v2575_v22  ;;  %v2593_v22 = vld [vmem:[%s3350_s22 + $0x10] sm:$0xff] (!%p2332_p6)  }
 0x474   : > { %2383 = vmatpush3.bf16.msra.mxu1 %v2576_v23  ;;  %v2594_v23 = vld [vmem:[%s3350_s22 + $0x18] sm:$0xff] (!%p2332_p6)  }
 0x475   : > { %2384 = vmatprep.subr.bf16.mxu1 %v2577_v24  ;;  %v2595_v24 = vld [vmem:[%s3350_s22 + $0x20] sm:$0xff] (!%p2332_p6)  }
 0x478   : > { %2385 = vmatpush3.bf16.msra.mxu1 %v2578_v25  ;;  %v2596_v25 = vld [vmem:[%s3350_s22 + $0x28] sm:$0xff] (!%p2332_p6)  }
 0x479   : > { %2386 = vmatprep.subr.bf16.mxu1 %v2579_v26  ;;  %v2597_v26 = vld [vmem:[%s3350_s22 + $0x30] sm:$0xff] (!%p2332_p6)  }
 0x47c   : > { %2387 = vmatpush3.bf16.msra.mxu1 %v2580_v27  ;;  %v2598_v27 = vld [vmem:[%s3350_s22 + $0x38] sm:$0xff] (!%p2332_p6)  }
 0x47d   : > { %2388 = vmatprep.subr.bf16.mxu1 %v2581_v28 }
 0x480   : > { %2389 = vmatpush3.bf16.msra.mxu1 %v2582_v29 }
 0x536   : > { %v1533_v40 = vpop.f32.mrb[0].mxu1 }
 0x537   : > { %v2453_v41 = vpop.f32.mrb[1].mxu1  ;;  %v1540_v14 = vadd.f32 %v1533_v40, %v3173_v35  ;;  %v1564_v35 = vrot.slane %v1559_v49, %v3206_v48  ;;  %v1695_v40 = vld [vmem:[%s873_s24] sm:$0x3] }
 0x538   : > { %v1536_v42 = vpop.f32.mrb[2].mxu1  ;;  %v1733_v41 = vrot.slane %v1694_v39, %v3206_v48  ;;  %v1752_v46 = vrot.slane %v1695_v40, %v3213_v50 }
 0x539   : > { %v1541_v43 = vadd.f32 %v1536_v42, %v3178_v36  ;;  %v2454_v44 = vpop.f32.mrb[3].mxu1  ;;  %v1568_v36 = vrot.slane %v1559_v49, %v3213_v50  ;;  %v1737_v42 = vrot.slane %v1694_v39, %v3213_v50 }
 0x53b   : > { %v1542_v45 = vpack.c.bf16 %v1541_v43, %v1540_v14 }
 0x53d   : > { %1684 = vmatmul.mubr.bf16.vlgmr.msra.gmra.mrb[12].mxu0 %v1542_v45  ;;  %v1748_v45 = vrot.slane %v1695_v40, %v3206_v48 }
 0x610   : > { %v1685_v51 = vpop.f32.mrb[12].mxu0 }
 0x611   : > { %v1686_v52 = vadd.f32 %v1685_v51, %v1564_v35  ;;  %v1687_v53 = vpop.f32.mrb[13].mxu0 }
 0x612   : > { %v1688_v54 = vadd.f32 %v1687_v53, %v1568_v36  ;;  %v1689_v55 = vpop.f32.mrb[14].mxu0 }
 0x613   : > { %v1690_v56 = vadd.f32 %v1689_v55, %v1564_v35  ;;  %v1691_v57 = vpop.f32.mrb[15].mxu0 }
 0x614   : > { %v1692_v58 = vadd.f32 %v1691_v57, %v1568_v36  ;;  %v1696_v59 = vadd.f32 %v1688_v54, %v1686_v52 }
 0x616   : > { %1697 = vadd.xlane.f32.xlu0 %v1696_v59  ;;  %v1699_v60 = vadd.f32 %v1692_v58, %v1690_v56 }
 0x618   : > { %1700 = vadd.xlane.f32.xlu1 %v1699_v60 }
 0x6a3   : > { %v1698_v63 = vpop.xlane.xlu0 %1697 }
 0x6a4   : > { %v1703_v0 = vmul.f32 0.00390625, %v1698_v63  ;;  %v2315_v63 = vld [vmem:[%s3411_s3] ss:$0 sm:$0xff] }
 0x6a5   : > { %v1701_v1 = vpop.xlane.xlu1 %1700 }
 0x6a6   : > { %v1705_v2 = vsub.f32 %v1686_v52, %v1703_v0  ;;  %v1706_v3 = vsub.f32 %v1688_v54, %v1703_v0  ;;  %v1704_v6 = vmul.f32 0.00390625, %v1701_v1 }
 0x6a8   : > { %v1707_v7 = vsub.f32 %v1690_v56, %v1704_v6  ;;  %v1708_v8 = vsub.f32 %v1692_v58, %v1704_v6  ;;  %v1709_v9 = vmul.f32 %v1705_v2, %v1705_v2  ;;  %v1710_v10 = vmul.f32 %v1706_v3, %v1706_v3 }
 0x6aa   : > { %v1713_v11 = vadd.f32 %v1710_v10, %v1709_v9  ;;  %v1711_v12 = vmul.f32 %v1707_v7, %v1707_v7  ;;  %v1712_v13 = vmul.f32 %v1708_v8, %v1708_v8 }
 0x6ac   : > { %1714 = vadd.xlane.f32.xlu0 %v1713_v11  ;;  %v1716_v15 = vadd.f32 %v1712_v13, %v1711_v12  ;;  %v2744_v13 = vmov (!%p2332_p6), 0.0  }
 0x6ad   : > { %2455 = vmatprep.subr.bf16.mxu0 (!%p2332_p6), %v2744_v13  ;;  %2471 = vmatprep.mubr.msk.bf16.mxu0 (!%p2332_p6), %vm2745_vm15, %v2744_v13 }
 0x6ae   : > { %1717 = vadd.xlane.f32.xlu1 %v1716_v15 }
 0x739   : > { %v1715_v30 = vpop.xlane.xlu0 %1714 }
 0x73a   : > { %v1719_v31 = vmul.f32 0.00390625, %v1715_v30 }
 0x73b   : > { %v1718_v32 = vpop.xlane.xlu1 %1717 }
 0x73c   : > { %v1721_v34 = vadd.f32 1e-05, %v1719_v31  ;;  %v1720_v37 = vmul.f32 0.00390625, %v1718_v32 }
 0x73e   : > { %2587 = vrsqrt.f32 %v1721_v34  ;;  %v1722_v38 = vadd.f32 1e-05, %v1720_v37 }
 0x740   : > { %2589 = vrsqrt.f32 %v1722_v38  ;;  %v2333_v38 = vld [vmem:[%s3412_s25] ss:$0 sm:$0xff] (!%p2332_p6) }
 0x748   : > { %v2588_v14 = vpop.eup %2587 }
 0x749   : > { %v1725_v43 = vmul.f32 %v2588_v14, %v1705_v2  ;;  %v1726_v44 = vmul.f32 %v2588_v14, %v1706_v3 }
 0x74a   : > { %v2590_v47 = vpop.eup %2589 }
 0x74b   : > { %v1727_v49 = vmul.f32 %v2590_v47, %v1707_v7  ;;  %v1728_v35 = vmul.f32 %v2590_v47, %v1708_v8  ;;  %v1741_v36 = vmul.f32 %v1737_v42, %v1726_v44  ;;  %v1740_v51 = vmul.f32 %v1733_v41, %v1725_v43 }
 0x74d   : > { %v1743_v52 = vmul.f32 %v1737_v42, %v1728_v35  ;;  %v1756_v53 = vadd.f32 %v1752_v46, %v1741_v36  ;;  %v1742_v54 = vmul.f32 %v1733_v41, %v1727_v49  ;;  %v1755_v55 = vadd.f32 %v1748_v45, %v1740_v51  ;;  %v2334_v42 = vld [vmem:[%s3413_s1] ss:$0 sm:$0xff] (!%p2332_p6) }
 0x74e   : > { %v2335_v35 = vld [vmem:[%s3414_s18] ss:$0 sm:$0xff] (!%p2332_p6) }
 0x74f   : > { %v1758_v56 = vadd.f32 %v1752_v46, %v1743_v52  ;;  %v1757_v57 = vadd.f32 %v1748_v45, %v1742_v54  ;;  %v1760_v58 = vmax.f32 %v1756_v53, 0.0  ;;  %v1759_v60 = vmax.f32 %v1755_v55, 0.0 }
 0x751   : > { %v1762_v59 = vmax.f32 %v1758_v56, 0.0  ;;  %v1761_v61 = vmax.f32 %v1757_v57, 0.0 }
 0x753   : > { %v1764_v62 = vpack.c.bf16 %v1762_v59, %v1760_v58  ;;  %v1763_v48 = vpack.c.bf16 %v1761_v61, %v1759_v60 }
 0x755   : > { %1932 = vmatprep.mubr.bf16.mxu1 %v1764_v62 }
 0x756   : > { %1933 = vmatmul.mubr.bf16.vlgmr.msra.gmra.mrb[4].mxu1 %v1763_v48 }
 0x829   : > { %v2390_v50 = vpop.f32.mrb[4].mxu1 }
 0x82a   : > { %v2391_v0 = vpop.f32.mrb[5].mxu1 }
 0x82b   : > { %v2392_v1 = vadd.f32 %v2391_v0, %v2390_v50  ;;  %v2393_v2 = vpop.f32.mrb[6].mxu1 }
 0x82c   : > { %v2394_v3 = vpop.f32.mrb[7].mxu1 }
 0x82d   : > { %v1935_v6 = vadd.f32 %v2392_v1, %v2315_v63  ;;  %v2395_v7 = vadd.f32 %v2394_v3, %v2393_v2 }
 0x82e   : > { %1950 = sbr.rel (%p2332_p6) target bundleno = 2634 (0xa4a), region = 132 }
 0x82f   : > { %v1941_v8 = vadd.f32 %v1935_v6, %v3140_v4  ;;  %v1938_v9 = vadd.f32 %v2395_v7, %v2315_v63  ;;  %v2591_v4 = vld [vmem:[%s3350_s22] sm:$0xff] (!%p2332_p6)  }
 0x830   : > { %2456 = vmatpush3.bf16.msra.mxu0 (!%p2332_p6), %v2591_v4 }
 0x831   : > { %v1943_v10 = vsel %vm3166_vm12, %v1935_v6, %v1941_v8  ;;  %v1942_v11 = vadd.f32 %v1938_v9, %v3142_v5  ;;  %2457 = vmatprep.subr.bf16.mxu0 (!%p2332_p6), %v2744_v13 }
 0x832   : > { %1945 = vst [vmem:[#allocation2] sm:$0xff] %v1943_v10  ;;  %1953 = vadd.xlane.f32.xlu0 (!%p2332_p6), %v1943_v10 }
 0x833   : > { %v1944_v12 = vsel %vm3166_vm12, %v1938_v9, %v1942_v11 }
 0x834   : > { %1946 = vst [vmem:[#allocation2 + $0x8] sm:$0xff] %v1944_v12  ;;  %2458 = vmatpush3.bf16.msra.mxu0 (!%p2332_p6), %v2592_v21 }
 0x835   : > { %2459 = vmatprep.subr.bf16.mxu0 %v2744_v13 }
 0x836   : > { %1955 = vadd.xlane.f32.xlu0 %v1944_v12 }
 0x838   : > { %2460 = vmatpush3.bf16.msra.mxu0 %v2593_v22 }
 0x839   : > { %2461 = vmatprep.subr.bf16.mxu0 %v2744_v13 }
 0x83c   : > { %2462 = vmatpush3.bf16.msra.mxu0 %v2594_v23 }
 0x83d   : > { %2463 = vmatprep.subr.bf16.mxu0 %v2744_v13 }
 0x840   : > { %2464 = vmatpush3.bf16.msra.mxu0 %v2595_v24 }
 0x841   : > { %2465 = vmatprep.subr.bf16.mxu0 %v2744_v13 }
 0x844   : > { %2466 = vmatpush3.bf16.msra.mxu0 %v2596_v25 }
 0x845   : > { %2467 = vmatprep.subr.bf16.mxu0 %v2744_v13 }
 0x848   : > { %2468 = vmatpush3.bf16.msra.mxu0 %v2597_v26 }
 0x849   : > { %2469 = vmatprep.subr.bf16.mxu0 %v2744_v13 }
 0x84c   : > { %2470 = vmatpush3.bf16.msra.mxu0 %v2598_v27 }
 0x8bf   : > { %v1954_v15 = vpop.xlane.xlu0 %1953 }
 0x8c0   : > { %v1957_v5 = vmul.f32 0.0078125, %v1954_v15 }
 0x8c2   : > { %v1959_v16 = vsub.f32 %v1943_v10, %v1957_v5 }
 0x8c3   : > { %v1956_v17 = vpop.xlane.xlu0 %1955 }
 0x8c4   : > { %v1958_v33 = vmul.f32 0.0078125, %v1956_v17  ;;  %v1961_v18 = vmul.f32 %v1959_v16, %v1959_v16 }
 0x8c6   : > { %v1960_v19 = vsub.f32 %v1944_v12, %v1958_v33  ;;  %1963 = vadd.xlane.f32.xlu1 %v1961_v18 }
 0x8c8   : > { %v1962_v20 = vmul.f32 %v1960_v19, %v1960_v19 }
 0x8ca   : > { %1965 = vadd.xlane.f32.xlu1 %v1962_v20 }
 0x953   : > { %v1964_v28 = vpop.xlane.xlu1 %1963 }
 0x954   : > { %v1967_v29 = vmul.f32 0.0078125, %v1964_v28 }
 0x956   : > { %v1969_v30 = vadd.f32 1e-05, %v1967_v29 }
 0x957   : > { %v1966_v31 = vpop.xlane.xlu1 %1965 }
 0x958   : > { %2599 = vrsqrt.f32 %v1969_v30  ;;  %v1968_v32 = vmul.f32 0.0078125, %v1966_v31 }
 0x95a   : > { %v1970_v34 = vadd.f32 1e-05, %v1968_v32 }
 0x95c   : > { %2601 = vrsqrt.f32 %v1970_v34 }
 0x962   : > { %v2600_v37 = vpop.eup %2599 }
 0x963   : > { %v1973_v39 = vmul.f32 %v2600_v37, %v1959_v16 }
 0x965   : > { %v1981_v40 = vmul.f32 %v2333_v38, %v1973_v39 }
 0x966   : > { %v2602_v41 = vpop.eup %2601 }
 0x967   : > { %v1974_v14 = vmul.f32 %v2602_v41, %v1960_v19  ;;  %v1989_v44 = vadd.f32 %v2334_v42, %v1981_v40 }
 0x969   : > { %v1982_v43 = vmul.f32 %v2333_v38, %v1974_v14  ;;  %v1991_v46 = vmax.f32 %v1989_v44, 0.0 }
 0x96b   : > { %v1990_v45 = vadd.f32 %v2334_v42, %v1982_v43 }
 0x96d   : > { %v1992_v47 = vmax.f32 %v1990_v45, 0.0 }
 0x96f   : > { %v1993_v49 = vpack.c.bf16 %v1992_v47, %v1991_v46 }
 0x971   : > { %2472 = vmatmul.mubr.bf16.vlgmr.msra.gmra.mrb[0].mxu0 %v1993_v49 }
 0xa44   : > { %v2099_v36 = vpop.f32.mrb[0].mxu0 }
 0xa45   : > { %v2100_v51 = vadd.f32 %v2335_v35, %v2099_v36  ;;  %v2473_v52 = vpop.f32.mrb[1].mxu0 }
 0xa46   : > { %v2102_v53 = vpop.f32.mrb[2].mxu0 }
 0xa47   : > { %2106 = vst [vmem:[#allocation11] sm:$0xff] %v2100_v51  ;;  %v2103_v54 = vadd.f32 %v2335_v35, %v2102_v53  ;;  %v2474_v55 = vpop.f32.mrb[3].mxu0 }
 0xa49   : > { %2107 = vst [vmem:[#allocation11 + $0x8] sm:$0xff] %v2103_v54 }
 0xa4a PF: > { %p2493_p1 = scmp.eq.s32.totalorder %s2893_s6, 2  ;;  %s2746_s4 = smov [#allocation11]  }
 0xa4b   : > { %s2114_s26 = sshll.u32 %s2746_s4, 4  ;;  %s2115_s26 = int_to_ptr.vmem [resolvable:$true] %s2114_s26 }
 0xa4c   : > { %s2663_s28 = scalar_lea.vmem %s2115_s26, 256  ;;  %p2670_p3 = scmp.lt.s32.totalorder %s2115_s26, %s2115_s26 }
 0xa4d   : > { %p2664_p2 = scmp.ne.s32.totalorder %s2115_s26, %s2663_s28  ;;  %p2671_p4 = scmp.lt.s32.totalorder %s2663_s28, %s2663_s28 }
 0xa4f   : > { %p2665_p13 = pnand %p2664_p2, %p2493_p1  ;;  %p2672_p10 = por %p2671_p4, %p2670_p3 }
 0xa51   : > { %p2666_p5 = pneg %p2665_p13 }
 0xa53   : > { %p2673_p12 = pnand %p2672_p10, %p2666_p5 }
 0xa55   : > { %2676 = shalt.err (!%p2673_p12)
}
 0xa56   : > { %s3415_s29 = sld [smem:[#allocation33_spill]] }
 0xa5c   : > { %s2677_s3 = scalar_lea.hbm %s3415_s29, 256 }
 0xa5d   : > { %p2678_p0 = scmp.ne.s32.totalorder %s3415_s29, %s2677_s3  ;;  %p2683_p11 = scmp.lt.u32.totalorder %s2677_s3, %s3415_s29 }
 0xa5f   : > { %p2679_p7 = pnand %p2678_p0, %p2493_p1 }
 0xa61   : > { %p2680_p8 = pneg %p2679_p7 }
 0xa63   : > { %p2685_p9 = pnand %p2683_p11, %p2680_p8 }
 0xa65   : > { %2688 = shalt.err (!%p2685_p9)
}
 0xa66   : > { %s2747_s21 = smov 128   ;;  %s2748_s1 = smov 8  }
 0xa67   : > { %2482 = dma.vmem_to_hbm [thread:$0]  (%p2493_p1), %s2115_s26, 256, %s3415_s29, [#allocation8], %s2747_s21, %s2747_s21, %s2748_s1  }
 0xa68   : > { %2714 = dma.done.wait (%p2493_p1), [#allocation8], 256  }
 0xa69   : > { %2716 = vsyncadd (%p2493_p1), [#allocation8], 4294967040 }
 0xa6a PF: > { %s3416_s28 = sld [smem:[#allocation17_spill]]  ;;  %s3417_s5 = sld [smem:[#allocation15_spill]] }
 0xa6b   : > { %s3418_s26 = sld [smem:[#allocation16_spill]]  ;;  %s3419_s27 = sld [smem:[#allocation18_spill]] }
 0xa70   : > { %p38_p6 = scmp.ge.s32.totalorder %s3416_s28, 5  }
 0xa72   :  { %40 = sbr.rel (!%p38_p6) target bundleno = 22 (0x16), region = 192 }
 0xa79   :  { %2130 = vsyncpa [#allocation7], 1 }
 0xa7a   :  { %2132 = vsyncpa [#allocation7 + $0x1], 1 }
 0xa7b   :  { %2133 = vsyncpa [#allocation10], 1 }
 0xa7c   :  { %2135 = vsyncpa [#allocation10 + $0x1], 1 }
 0xa7d   :  { %2136 = vsyncpa [#allocation8], 1 }
 0xa7e   :  { %2138 = vsyncpa [#allocation8 + $0x1], 1 }

</bundles_post_ra>
